<compile_context>
chip_gen: v5e
topology: v5e:2x2
jax: 0.10.0
libtpu: 0.0.40
codegen_flags: <defaults>
</compile_context>

<pallas_src>
import functools
import math

import jax
import jax.numpy as jnp
from jax.experimental import pallas as pl
from jax.experimental.pallas import tpu as pltpu


def _round_up(x: int, m: int) -> int:
    return -(-x // m) * m


def _bilinear_matrix(out_size: int, in_size: int) -> jnp.ndarray:
    """(out_size, in_size) matrix matching PyTorch F.interpolate(mode='bilinear',
    align_corners=False) along one axis (half-pixel centers, edge clamp)."""
    dst = jnp.arange(out_size, dtype=jnp.float32)
    src = (dst + 0.5) * (in_size / out_size) - 0.5
    src = jnp.maximum(src, 0.0)                       # PyTorch clamps negatives
    x0 = jnp.clip(jnp.floor(src).astype(jnp.int32), 0, in_size - 1)
    x1 = jnp.minimum(x0 + 1, in_size - 1)
    lam = src - x0.astype(jnp.float32)
    oh0 = jax.nn.one_hot(x0, in_size, dtype=jnp.float32)
    oh1 = jax.nn.one_hot(x1, in_size, dtype=jnp.float32)
    return (1.0 - lam)[:, None] * oh0 + lam[:, None] * oh1


def _nearest_matrix(out_size: int, in_size: int) -> jnp.ndarray:
    """(out_size, in_size) selection matrix matching PyTorch mode='nearest'
    (src = floor(dst * in / out)), built with exact integer math."""
    dst = jnp.arange(out_size, dtype=jnp.int32)
    src = jnp.clip((dst * in_size) // out_size, 0, in_size - 1)
    return jax.nn.one_hot(src, in_size, dtype=jnp.float32)


def _interp_kernel(wht_ref, wwt_ref, x_ref, o_ref, *scratch):
    # wht_ref: (Hin, Hout)     Wh^T, resident across the grid
    # wwt_ref: (Win, Wout)     Ww^T, resident across the grid
    # x_ref:   (B, Hin*Win) lane-dense slab  OR (B, Hin, Win) 3-D block
    # o_ref:   (B, Hout*Wout) lane-dense slab OR (B, Hout, Wout) 3-D block
    h_in, h_out = wht_ref.shape
    w_in, w_out = wwt_ref.shape
    b = x_ref.shape[0]

    if len(x_ref.shape) == 2:
        # Lane-dense input slab -> (B, Hin, Win) scratch: one on-chip relayout
        # replacing an 8x lane-padded, 64-byte-row HBM->VMEM DMA.
        (xs_ref,) = scratch
        xf = x_ref[...]                                           # (B, Hin*Win)
        for r in range(h_in):
            xs_ref[:, r, :] = xf[:, r * w_in:(r + 1) * w_in]
        x = xs_ref[...]                                           # (B, Hin, Win)
    else:
        x = x_ref[...]                                            # (B, Hin, Win)

    # Height pass: fold (batch, width) into M -> (B*Win, Hin) @ (Hin, Hout).
    xt = jnp.transpose(x, (0, 2, 1)).reshape(b * w_in, h_in)
    t = jnp.dot(xt, wht_ref[...], preferred_element_type=jnp.float32)
    # Note: for bf16 inputs this adds one extra rounding step vs PyTorch's f32
    # per-element accumulation (last-ulp differences); f32 inputs are exact.
    t = t.astype(x.dtype)                                         # (B*Win, Hout)

    # Width pass: fold (batch, out-height) into M -> (B*Hout, Win) @ (Win, Wout).
    tt = jnp.transpose(t.reshape(b, w_in, h_out), (0, 2, 1)).reshape(b * h_out, w_in)
    out = jnp.dot(tt, wwt_ref[...], preferred_element_type=jnp.float32)
    out = out.astype(o_ref.dtype).reshape(b, h_out, w_out)

    if len(o_ref.shape) == 2:
        # Lane-dense output slab: place each output row at its lane offset so
        # the output VMEM buffer and the writeback DMA are fully dense.
        for r in range(h_out):
            o_ref[:, r * w_out:(r + 1) * w_out] = out[:, r, :]
    else:
        o_ref[...] = out


def _vmem_config():
    """(vmem_limit_bytes, block_budget_bytes) derived from the chip's VMEM:
    96/48 MiB on v5e/v6e (128 MiB physical), 48/24 MiB on v7x (64 MiB)."""
    cap = 64 * 1024 * 1024                       # conservative default (v7x)
    try:
        cap = int(pltpu.get_tpu_info().vmem_capacity_bytes) or cap
    except Exception:
        pass
    cap = max(32 * 1024 * 1024, min(cap, 128 * 1024 * 1024))
    return (cap * 3) // 4, (cap * 3) // 8


def _pick_plane_batch(nc, h, w, h_out, w_out, itemsize, budget,
                      dense_in, dense_out):
    """Planes per grid step from a padding-aware VMEM footprint.
    Returns a divisor of nc; a multiple of 8 whenever a lane-dense 2-D slab is
    used (sublane constraint on the block's second-to-last dim)."""
    lane = lambda c: _round_up(c, 128)
    sub = lambda r: _round_up(r, max(1, (8 * 4) // itemsize))   # 8 rows f32, 16 bf16
    sub32 = lambda r: _round_up(r, 8)

    in_blk = lane(h * w) * itemsize if dense_in else sub(h) * lane(w) * itemsize
    out_blk = (lane(h_out * w_out) * itemsize if dense_out
               else sub(h_out) * lane(w_out) * itemsize)
    per_plane = (
        2 * in_blk + 2 * out_blk                         # double-buffered pipeline blocks
        + (sub(h) * lane(w) * itemsize if dense_in else 0)   # input relayout scratch
        + sub(h) * lane(w) * itemsize                    # x as (B, Hin, Win)
        + sub(w) * lane(h) * itemsize                    # x^T
        + sub32(w) * lane(h_out) * 4                     # height-pass f32 result
        + sub(w) * lane(h_out) * itemsize                # cast copy
        + sub(h_out) * lane(w) * itemsize                # t^T
        + sub32(h_out) * lane(w_out) * 4                 # width-pass f32 result
        + sub(h_out) * lane(w_out) * itemsize            # cast copy before store
    )

    b = max(1, min(nc, budget // max(per_plane, 1)))
    step = 8 if (dense_in or dense_out) else 1
    if step > 1:
        b = max(step, (b // step) * step)
    # Keep >= 4 grid steps (2 per TensorCore on v7x megacore) when nc allows,
    # else >= 2, never dropping below the sublane-aligned minimum block.
    for steps in (4, 2):
        cap = ((nc // steps) // step) * step
        if cap >= step:
            b = min(b, cap)
            break
    while nc % b:
        b -= step
    return max(b, 1)


@functools.partial(jax.jit, static_argnames=("scale", "mode"))
def interpolate(x: jnp.ndarray, scale: int = 2, mode: str = "bilinear") -> jnp.ndarray:
    """Pallas equivalent of Interpolate(scale, mode).forward for NCHW input."""
    n, c, h, w = x.shape
    h_out, w_out = int(math.floor(h * scale)), int(math.floor(w * scale))

    # Integer inputs: interpolation weights are fractional and v7x's MXU has no
    # int path, so upcast to f32 (PyTorch bilinear does not support ints either).
    if not jnp.issubdtype(x.dtype, jnp.floating):
        x = x.astype(jnp.float32)

    if mode == "bilinear":
        wh = _bilinear_matrix(h_out, h)
        ww = _bilinear_matrix(w_out, w)
    elif mode == "nearest":
        # TODO(synk): nearest with integer scale could use a pure replication
        # kernel (no MXU/transposes, ~2x smaller per-plane VMEM); kept on the
        # shared matmul path since the one-hot matmul is exact.
        wh = _nearest_matrix(h_out, h)
        ww = _nearest_matrix(w_out, w)
    else:
        # TODO(synk): bicubic / area interpolation modes not implemented.
        raise NotImplementedError(f"mode={mode}")

    # Pre-transposed weights in the input dtype (bf16 stays on the bf16 MXU
    # path; accumulation inside the kernel is f32 via preferred_element_type).
    wht = wh.T.astype(x.dtype)                    # (Hin, Hout)
    wwt = ww.T.astype(x.dtype)                    # (Win, Wout)

    nc = n * c
    itemsize = x.dtype.itemsize
    vmem_limit, budget = _vmem_config()

    # Lane-dense 2-D slabs whenever the minor dim is narrower than a full vreg
    # row; requires nc % 8 == 0 so the block's sublane dim stays 8-aligned.
    dense_in = (w % 128 != 0) and (nc % 8 == 0)
    dense_out = (w_out % 128 != 0) and (nc % 8 == 0)

    b = _pick_plane_batch(nc, h, w, h_out, w_out, itemsize, budget,
                          dense_in, dense_out)

    if dense_in:
        x_ops = x.reshape(nc, h * w)
        in_spec_x = pl.BlockSpec((b, h * w), lambda i: (i, 0))
        scratch_shapes = [pltpu.VMEM((b, h, w), x.dtype)]
    else:
        x_ops = x.reshape(nc, h, w)
        in_spec_x = pl.BlockSpec((b, h, w), lambda i: (i, 0, 0))
        scratch_shapes = []

    if dense_out:
        out_shape = jax.ShapeDtypeStruct((nc, h_out * w_out), x.dtype)
        out_spec = pl.BlockSpec((b, h_out * w_out), lambda i: (i, 0))
    else:
        out_shape = jax.ShapeDtypeStruct((nc, h_out, w_out), x.dtype)
        out_spec = pl.BlockSpec((b, h_out, w_out), lambda i: (i, 0, 0))

    flops = 2 * nc * (w * h * h_out + h_out * w * w_out)
    bytes_accessed = (nc * (h * w + h_out * w_out) * itemsize
                      + (wht.size + wwt.size) * itemsize)

    out_flat = pl.pallas_call(
        _interp_kernel,
        out_shape=out_shape,
        grid_spec=pltpu.PrefetchScalarGridSpec(
            num_scalar_prefetch=0,
            grid=(nc // b,),
            in_specs=[
                pl.BlockSpec((h, h_out), lambda i: (0, 0)),   # Wh^T (resident)
                pl.BlockSpec((w, w_out), lambda i: (0, 0)),   # Ww^T (resident)
                in_spec_x,                                    # B input planes
            ],
            out_specs=out_spec,
            scratch_shapes=scratch_shapes,
        ),
        compiler_params=pltpu.CompilerParams(
            dimension_semantics=("parallel",),
            vmem_limit_bytes=vmem_limit,
        ),
        cost_estimate=pl.CostEstimate(
            flops=flops, transcendentals=0, bytes_accessed=bytes_accessed),
    )(wht, wwt, x_ops)

    return out_flat.reshape(n, c, h_out, w_out)


if __name__ == "__main__":
    key = jax.random.PRNGKey(0)
    # Small NCHW input consistent with the module's forward.
    x = jax.random.normal(key, (2, 4, 16, 16), dtype=jnp.float32)

    # Bilinear: half-pixel semantics == PyTorch align_corners=False == jax.image.resize.
    y = interpolate(x, scale=2, mode="bilinear")
    y = jax.block_until_ready(y)
    assert y.shape == (2, 4, 32, 32)
    assert bool(jnp.all(jnp.isfinite(y)))
    ref = jax.image.resize(x, (2, 4, 32, 32), method="bilinear")
    assert bool(jnp.allclose(y, ref, atol=1e-5, rtol=1e-5))

    # Nearest: PyTorch 'nearest' semantics (src = floor(dst * in / out)).
    y_n = interpolate(x, scale=2, mode="nearest")
    y_n = jax.block_until_ready(y_n)
    idx = (jnp.arange(32) // 2).astype(jnp.int32)
    ref_n = x[:, :, idx, :][:, :, :, idx]
    assert bool(jnp.array_equal(y_n, ref_n))

    print("KERNEL_OK")
</pallas_src>

<mosaic_0001>
module attributes {stable_mosaic.version = 11 : i64} {
  func.func @_interp_kernel(%arg0: i32, %arg1: memref<16x32xf32, #tpu.memory_space<vmem>>, %arg2: memref<16x32xf32, #tpu.memory_space<vmem>>, %arg3: memref<8x256xf32, #tpu.memory_space<vmem>>, %arg4: memref<8x1024xf32, #tpu.memory_space<vmem>>, %arg5: memref<8x16x16xf32, #tpu.memory_space<vmem>>) attributes {dimension_semantics = [#tpu.dimension_semantics<parallel>], iteration_bounds = array<i64: 1>, scalar_prefetch = 0 : i64, scratch_operands = 1 : i64, tpu.core_type = #tpu.core_type<tc>, window_params = [{pipeline_mode = #tpu.pipeline_mode<synchronous>, transform_indices = @transform_0, window_bounds = array<i64: 16, 32>}, {pipeline_mode = #tpu.pipeline_mode<synchronous>, transform_indices = @transform_1, window_bounds = array<i64: 16, 32>}, {transform_indices = @transform_2, window_bounds = array<i64: 8, 256>}, {transform_indices = @transform_3, window_bounds = array<i64: 8, 1024>}]} {
    %c0 = arith.constant 0 : index
    %c0_0 = arith.constant 0 : index
    %0 = vector.load %arg3[%c0, %c0_0] : memref<8x256xf32, #tpu.memory_space<vmem>>, vector<8x256xf32>
    %1 = vector.extract_strided_slice %0 {offsets = [0, 0], sizes = [8, 16], strides = [1, 1]} : vector<8x256xf32> to vector<8x16xf32>
    %c0_1 = arith.constant 0 : index
    %c0_2 = arith.constant 0 : index
    %c0_3 = arith.constant 0 : index
    %2 = vector.load %arg5[%c0_1, %c0_2, %c0_3] : memref<8x16x16xf32, #tpu.memory_space<vmem>>, vector<8x1x16xf32>
    %3 = vector.shape_cast %2 : vector<8x1x16xf32> to vector<8x16xf32>
    %4 = vector.shape_cast %1 : vector<8x16xf32> to vector<8x1x16xf32>
    tpu.vector_store %arg5[%c0_1, %c0_2, %c0_3], %4 {strides = array<i32>} : memref<8x16x16xf32, #tpu.memory_space<vmem>>, vector<8x1x16xf32>,
    %5 = vector.extract_strided_slice %0 {offsets = [0, 16], sizes = [8, 16], strides = [1, 1]} : vector<8x256xf32> to vector<8x16xf32>
    %c0_4 = arith.constant 0 : index
    %c1 = arith.constant 1 : index
    %c0_5 = arith.constant 0 : index
    %6 = vector.load %arg5[%c0_4, %c1, %c0_5] : memref<8x16x16xf32, #tpu.memory_space<vmem>>, vector<8x1x16xf32>
    %7 = vector.shape_cast %6 : vector<8x1x16xf32> to vector<8x16xf32>
    %8 = vector.shape_cast %5 : vector<8x16xf32> to vector<8x1x16xf32>
    tpu.vector_store %arg5[%c0_4, %c1, %c0_5], %8 {strides = array<i32>} : memref<8x16x16xf32, #tpu.memory_space<vmem>>, vector<8x1x16xf32>,
    %9 = vector.extract_strided_slice %0 {offsets = [0, 32], sizes = [8, 16], strides = [1, 1]} : vector<8x256xf32> to vector<8x16xf32>
    %c0_6 = arith.constant 0 : index
    %c2 = arith.constant 2 : index
    %c0_7 = arith.constant 0 : index
    %10 = vector.load %arg5[%c0_6, %c2, %c0_7] : memref<8x16x16xf32, #tpu.memory_space<vmem>>, vector<8x1x16xf32>
    %11 = vector.shape_cast %10 : vector<8x1x16xf32> to vector<8x16xf32>
    %12 = vector.shape_cast %9 : vector<8x16xf32> to vector<8x1x16xf32>
    tpu.vector_store %arg5[%c0_6, %c2, %c0_7], %12 {strides = array<i32>} : memref<8x16x16xf32, #tpu.memory_space<vmem>>, vector<8x1x16xf32>,
    %13 = vector.extract_strided_slice %0 {offsets = [0, 48], sizes = [8, 16], strides = [1, 1]} : vector<8x256xf32> to vector<8x16xf32>
    %c0_8 = arith.constant 0 : index
    %c3 = arith.constant 3 : index
    %c0_9 = arith.constant 0 : index
    %14 = vector.load %arg5[%c0_8, %c3, %c0_9] : memref<8x16x16xf32, #tpu.memory_space<vmem>>, vector<8x1x16xf32>
    %15 = vector.shape_cast %14 : vector<8x1x16xf32> to vector<8x16xf32>
    %16 = vector.shape_cast %13 : vector<8x16xf32> to vector<8x1x16xf32>
    tpu.vector_store %arg5[%c0_8, %c3, %c0_9], %16 {strides = array<i32>} : memref<8x16x16xf32, #tpu.memory_space<vmem>>, vector<8x1x16xf32>,
    %17 = vector.extract_strided_slice %0 {offsets = [0, 64], sizes = [8, 16], strides = [1, 1]} : vector<8x256xf32> to vector<8x16xf32>
    %c0_10 = arith.constant 0 : index
    %c4 = arith.constant 4 : index
    %c0_11 = arith.constant 0 : index
    %18 = vector.load %arg5[%c0_10, %c4, %c0_11] : memref<8x16x16xf32, #tpu.memory_space<vmem>>, vector<8x1x16xf32>
    %19 = vector.shape_cast %18 : vector<8x1x16xf32> to vector<8x16xf32>
    %20 = vector.shape_cast %17 : vector<8x16xf32> to vector<8x1x16xf32>
    tpu.vector_store %arg5[%c0_10, %c4, %c0_11], %20 {strides = array<i32>} : memref<8x16x16xf32, #tpu.memory_space<vmem>>, vector<8x1x16xf32>,
    %21 = vector.extract_strided_slice %0 {offsets = [0, 80], sizes = [8, 16], strides = [1, 1]} : vector<8x256xf32> to vector<8x16xf32>
    %c0_12 = arith.constant 0 : index
    %c5 = arith.constant 5 : index
    %c0_13 = arith.constant 0 : index
    %22 = vector.load %arg5[%c0_12, %c5, %c0_13] : memref<8x16x16xf32, #tpu.memory_space<vmem>>, vector<8x1x16xf32>
    %23 = vector.shape_cast %22 : vector<8x1x16xf32> to vector<8x16xf32>
    %24 = vector.shape_cast %21 : vector<8x16xf32> to vector<8x1x16xf32>
    tpu.vector_store %arg5[%c0_12, %c5, %c0_13], %24 {strides = array<i32>} : memref<8x16x16xf32, #tpu.memory_space<vmem>>, vector<8x1x16xf32>,
    %25 = vector.extract_strided_slice %0 {offsets = [0, 96], sizes = [8, 16], strides = [1, 1]} : vector<8x256xf32> to vector<8x16xf32>
    %c0_14 = arith.constant 0 : index
    %c6 = arith.constant 6 : index
    %c0_15 = arith.constant 0 : index
    %26 = vector.load %arg5[%c0_14, %c6, %c0_15] : memref<8x16x16xf32, #tpu.memory_space<vmem>>, vector<8x1x16xf32>
    %27 = vector.shape_cast %26 : vector<8x1x16xf32> to vector<8x16xf32>
    %28 = vector.shape_cast %25 : vector<8x16xf32> to vector<8x1x16xf32>
    tpu.vector_store %arg5[%c0_14, %c6, %c0_15], %28 {strides = array<i32>} : memref<8x16x16xf32, #tpu.memory_space<vmem>>, vector<8x1x16xf32>,
    %29 = vector.extract_strided_slice %0 {offsets = [0, 112], sizes = [8, 16], strides = [1, 1]} : vector<8x256xf32> to vector<8x16xf32>
    %c0_16 = arith.constant 0 : index
    %c7 = arith.constant 7 : index
    %c0_17 = arith.constant 0 : index
    %30 = vector.load %arg5[%c0_16, %c7, %c0_17] : memref<8x16x16xf32, #tpu.memory_space<vmem>>, vector<8x1x16xf32>
    %31 = vector.shape_cast %30 : vector<8x1x16xf32> to vector<8x16xf32>
    %32 = vector.shape_cast %29 : vector<8x16xf32> to vector<8x1x16xf32>
    tpu.vector_store %arg5[%c0_16, %c7, %c0_17], %32 {strides = array<i32>} : memref<8x16x16xf32, #tpu.memory_space<vmem>>, vector<8x1x16xf32>,
    %33 = vector.extract_strided_slice %0 {offsets = [0, 128], sizes = [8, 16], strides = [1, 1]} : vector<8x256xf32> to vector<8x16xf32>
    %c0_18 = arith.constant 0 : index
    %c8 = arith.constant 8 : index
    %c0_19 = arith.constant 0 : index
    %34 = vector.load %arg5[%c0_18, %c8, %c0_19] : memref<8x16x16xf32, #tpu.memory_space<vmem>>, vector<8x1x16xf32>
    %35 = vector.shape_cast %34 : vector<8x1x16xf32> to vector<8x16xf32>
    %36 = vector.shape_cast %33 : vector<8x16xf32> to vector<8x1x16xf32>
    tpu.vector_store %arg5[%c0_18, %c8, %c0_19], %36 {strides = array<i32>} : memref<8x16x16xf32, #tpu.memory_space<vmem>>, vector<8x1x16xf32>,
    %37 = vector.extract_strided_slice %0 {offsets = [0, 144], sizes = [8, 16], strides = [1, 1]} : vector<8x256xf32> to vector<8x16xf32>
    %c0_20 = arith.constant 0 : index
    %c9 = arith.constant 9 : index
    %c0_21 = arith.constant 0 : index
    %38 = vector.load %arg5[%c0_20, %c9, %c0_21] : memref<8x16x16xf32, #tpu.memory_space<vmem>>, vector<8x1x16xf32>
    %39 = vector.shape_cast %38 : vector<8x1x16xf32> to vector<8x16xf32>
    %40 = vector.shape_cast %37 : vector<8x16xf32> to vector<8x1x16xf32>
    tpu.vector_store %arg5[%c0_20, %c9, %c0_21], %40 {strides = array<i32>} : memref<8x16x16xf32, #tpu.memory_space<vmem>>, vector<8x1x16xf32>,
    %41 = vector.extract_strided_slice %0 {offsets = [0, 160], sizes = [8, 16], strides = [1, 1]} : vector<8x256xf32> to vector<8x16xf32>
    %c0_22 = arith.constant 0 : index
    %c10 = arith.constant 10 : index
    %c0_23 = arith.constant 0 : index
    %42 = vector.load %arg5[%c0_22, %c10, %c0_23] : memref<8x16x16xf32, #tpu.memory_space<vmem>>, vector<8x1x16xf32>
    %43 = vector.shape_cast %42 : vector<8x1x16xf32> to vector<8x16xf32>
    %44 = vector.shape_cast %41 : vector<8x16xf32> to vector<8x1x16xf32>
    tpu.vector_store %arg5[%c0_22, %c10, %c0_23], %44 {strides = array<i32>} : memref<8x16x16xf32, #tpu.memory_space<vmem>>, vector<8x1x16xf32>,
    %45 = vector.extract_strided_slice %0 {offsets = [0, 176], sizes = [8, 16], strides = [1, 1]} : vector<8x256xf32> to vector<8x16xf32>
    %c0_24 = arith.constant 0 : index
    %c11 = arith.constant 11 : index
    %c0_25 = arith.constant 0 : index
    %46 = vector.load %arg5[%c0_24, %c11, %c0_25] : memref<8x16x16xf32, #tpu.memory_space<vmem>>, vector<8x1x16xf32>
    %47 = vector.shape_cast %46 : vector<8x1x16xf32> to vector<8x16xf32>
    %48 = vector.shape_cast %45 : vector<8x16xf32> to vector<8x1x16xf32>
    tpu.vector_store %arg5[%c0_24, %c11, %c0_25], %48 {strides = array<i32>} : memref<8x16x16xf32, #tpu.memory_space<vmem>>, vector<8x1x16xf32>,
    %49 = vector.extract_strided_slice %0 {offsets = [0, 192], sizes = [8, 16], strides = [1, 1]} : vector<8x256xf32> to vector<8x16xf32>
    %c0_26 = arith.constant 0 : index
    %c12 = arith.constant 12 : index
    %c0_27 = arith.constant 0 : index
    %50 = vector.load %arg5[%c0_26, %c12, %c0_27] : memref<8x16x16xf32, #tpu.memory_space<vmem>>, vector<8x1x16xf32>
    %51 = vector.shape_cast %50 : vector<8x1x16xf32> to vector<8x16xf32>
    %52 = vector.shape_cast %49 : vector<8x16xf32> to vector<8x1x16xf32>
    tpu.vector_store %arg5[%c0_26, %c12, %c0_27], %52 {strides = array<i32>} : memref<8x16x16xf32, #tpu.memory_space<vmem>>, vector<8x1x16xf32>,
    %53 = vector.extract_strided_slice %0 {offsets = [0, 208], sizes = [8, 16], strides = [1, 1]} : vector<8x256xf32> to vector<8x16xf32>
    %c0_28 = arith.constant 0 : index
    %c13 = arith.constant 13 : index
    %c0_29 = arith.constant 0 : index
    %54 = vector.load %arg5[%c0_28, %c13, %c0_29] : memref<8x16x16xf32, #tpu.memory_space<vmem>>, vector<8x1x16xf32>
    %55 = vector.shape_cast %54 : vector<8x1x16xf32> to vector<8x16xf32>
    %56 = vector.shape_cast %53 : vector<8x16xf32> to vector<8x1x16xf32>
    tpu.vector_store %arg5[%c0_28, %c13, %c0_29], %56 {strides = array<i32>} : memref<8x16x16xf32, #tpu.memory_space<vmem>>, vector<8x1x16xf32>,
    %57 = vector.extract_strided_slice %0 {offsets = [0, 224], sizes = [8, 16], strides = [1, 1]} : vector<8x256xf32> to vector<8x16xf32>
    %c0_30 = arith.constant 0 : index
    %c14 = arith.constant 14 : index
    %c0_31 = arith.constant 0 : index
    %58 = vector.load %arg5[%c0_30, %c14, %c0_31] : memref<8x16x16xf32, #tpu.memory_space<vmem>>, vector<8x1x16xf32>
    %59 = vector.shape_cast %58 : vector<8x1x16xf32> to vector<8x16xf32>
    %60 = vector.shape_cast %57 : vector<8x16xf32> to vector<8x1x16xf32>
    tpu.vector_store %arg5[%c0_30, %c14, %c0_31], %60 {strides = array<i32>} : memref<8x16x16xf32, #tpu.memory_space<vmem>>, vector<8x1x16xf32>,
    %61 = vector.extract_strided_slice %0 {offsets = [0, 240], sizes = [8, 16], strides = [1, 1]} : vector<8x256xf32> to vector<8x16xf32>
    %c0_32 = arith.constant 0 : index
    %c15 = arith.constant 15 : index
    %c0_33 = arith.constant 0 : index
    %62 = vector.load %arg5[%c0_32, %c15, %c0_33] : memref<8x16x16xf32, #tpu.memory_space<vmem>>, vector<8x1x16xf32>
    %63 = vector.shape_cast %62 : vector<8x1x16xf32> to vector<8x16xf32>
    %64 = vector.shape_cast %61 : vector<8x16xf32> to vector<8x1x16xf32>
    tpu.vector_store %arg5[%c0_32, %c15, %c0_33], %64 {strides = array<i32>} : memref<8x16x16xf32, #tpu.memory_space<vmem>>, vector<8x1x16xf32>,
    %c0_34 = arith.constant 0 : index
    %c0_35 = arith.constant 0 : index
    %c0_36 = arith.constant 0 : index
    %65 = vector.load %arg5[%c0_34, %c0_35, %c0_36] : memref<8x16x16xf32, #tpu.memory_space<vmem>>, vector<8x16x16xf32>
    %66 = tpu.transpose %65, [0, 2, 1] : vector<8x16x16xf32> -> vector<8x16x16xf32>
    %67 = vector.shape_cast %66 : vector<8x16x16xf32> to vector<128x16xf32>
    %c0_37 = arith.constant 0 : index
    %c0_38 = arith.constant 0 : index
    %68 = vector.load %arg1[%c0_37, %c0_38] : memref<16x32xf32, #tpu.memory_space<vmem>>, vector<16x32xf32>
    %cst = arith.constant dense<0.000000e+00> : vector<128x32xf32>
    %69 = tpu.matmul %67, %68, %cst {dimension_numbers = #tpu.dot_dimension_numbers<[1], [0], [0], [1], [0, 0, 1, 1], [], []>} : vector<128x16xf32>, vector<16x32xf32>, vector<128x32xf32> -> vector<128x32xf32>
    %70 = vector.shape_cast %69 : vector<128x32xf32> to vector<8x16x32xf32>
    %71 = tpu.transpose %70, [0, 2, 1] : vector<8x16x32xf32> -> vector<8x32x16xf32>
    %72 = vector.shape_cast %71 : vector<8x32x16xf32> to vector<256x16xf32>
    %c0_39 = arith.constant 0 : index
    %c0_40 = arith.constant 0 : index
    %73 = vector.load %arg2[%c0_39, %c0_40] : memref<16x32xf32, #tpu.memory_space<vmem>>, vector<16x32xf32>
    %cst_41 = arith.constant dense<0.000000e+00> : vector<256x32xf32>
    %74 = tpu.matmul %72, %73, %cst_41 {dimension_numbers = #tpu.dot_dimension_numbers<[1], [0], [0], [1], [0, 0, 1, 1], [], []>} : vector<256x16xf32>, vector<16x32xf32>, vector<256x32xf32> -> vector<256x32xf32>
    %75 = vector.shape_cast %74 : vector<256x32xf32> to vector<8x32x32xf32>
    %76 = vector.extract_strided_slice %75 {offsets = [0, 0, 0], sizes = [8, 1, 32], strides = [1, 1, 1]} : vector<8x32x32xf32> to vector<8x1x32xf32>
    %77 = vector.shape_cast %76 : vector<8x1x32xf32> to vector<8x32xf32>
    %c0_42 = arith.constant 0 : index
    %c0_43 = arith.constant 0 : index
    %78 = vector.load %arg4[%c0_42, %c0_43] : memref<8x1024xf32, #tpu.memory_space<vmem>>, vector<8x32xf32>
    tpu.vector_store %arg4[%c0_42, %c0_43], %77 {strides = array<i32>} : memref<8x1024xf32, #tpu.memory_space<vmem>>, vector<8x32xf32>,
    %79 = vector.extract_strided_slice %75 {offsets = [0, 1, 0], sizes = [8, 1, 32], strides = [1, 1, 1]} : vector<8x32x32xf32> to vector<8x1x32xf32>
    %80 = vector.shape_cast %79 : vector<8x1x32xf32> to vector<8x32xf32>
    %c0_44 = arith.constant 0 : index
    %c32 = arith.constant 32 : index
    %81 = vector.load %arg4[%c0_44, %c32] : memref<8x1024xf32, #tpu.memory_space<vmem>>, vector<8x32xf32>
    tpu.vector_store %arg4[%c0_44, %c32], %80 {strides = array<i32>} : memref<8x1024xf32, #tpu.memory_space<vmem>>, vector<8x32xf32>,
    %82 = vector.extract_strided_slice %75 {offsets = [0, 2, 0], sizes = [8, 1, 32], strides = [1, 1, 1]} : vector<8x32x32xf32> to vector<8x1x32xf32>
    %83 = vector.shape_cast %82 : vector<8x1x32xf32> to vector<8x32xf32>
    %c0_45 = arith.constant 0 : index
    %c64 = arith.constant 64 : index
    %84 = vector.load %arg4[%c0_45, %c64] : memref<8x1024xf32, #tpu.memory_space<vmem>>, vector<8x32xf32>
    tpu.vector_store %arg4[%c0_45, %c64], %83 {strides = array<i32>} : memref<8x1024xf32, #tpu.memory_space<vmem>>, vector<8x32xf32>,
    %85 = vector.extract_strided_slice %75 {offsets = [0, 3, 0], sizes = [8, 1, 32], strides = [1, 1, 1]} : vector<8x32x32xf32> to vector<8x1x32xf32>
    %86 = vector.shape_cast %85 : vector<8x1x32xf32> to vector<8x32xf32>
    %c0_46 = arith.constant 0 : index
    %c96 = arith.constant 96 : index
    %87 = vector.load %arg4[%c0_46, %c96] : memref<8x1024xf32, #tpu.memory_space<vmem>>, vector<8x32xf32>
    tpu.vector_store %arg4[%c0_46, %c96], %86 {strides = array<i32>} : memref<8x1024xf32, #tpu.memory_space<vmem>>, vector<8x32xf32>,
    %88 = vector.extract_strided_slice %75 {offsets = [0, 4, 0], sizes = [8, 1, 32], strides = [1, 1, 1]} : vector<8x32x32xf32> to vector<8x1x32xf32>
    %89 = vector.shape_cast %88 : vector<8x1x32xf32> to vector<8x32xf32>
    %c0_47 = arith.constant 0 : index
    %c128 = arith.constant 128 : index
    %90 = vector.load %arg4[%c0_47, %c128] : memref<8x1024xf32, #tpu.memory_space<vmem>>, vector<8x32xf32>
    tpu.vector_store %arg4[%c0_47, %c128], %89 {strides = array<i32>} : memref<8x1024xf32, #tpu.memory_space<vmem>>, vector<8x32xf32>,
    %91 = vector.extract_strided_slice %75 {offsets = [0, 5, 0], sizes = [8, 1, 32], strides = [1, 1, 1]} : vector<8x32x32xf32> to vector<8x1x32xf32>
    %92 = vector.shape_cast %91 : vector<8x1x32xf32> to vector<8x32xf32>
    %c0_48 = arith.constant 0 : index
    %c160 = arith.constant 160 : index
    %93 = vector.load %arg4[%c0_48, %c160] : memref<8x1024xf32, #tpu.memory_space<vmem>>, vector<8x32xf32>
    tpu.vector_store %arg4[%c0_48, %c160], %92 {strides = array<i32>} : memref<8x1024xf32, #tpu.memory_space<vmem>>, vector<8x32xf32>,
    %94 = vector.extract_strided_slice %75 {offsets = [0, 6, 0], sizes = [8, 1, 32], strides = [1, 1, 1]} : vector<8x32x32xf32> to vector<8x1x32xf32>
    %95 = vector.shape_cast %94 : vector<8x1x32xf32> to vector<8x32xf32>
    %c0_49 = arith.constant 0 : index
    %c192 = arith.constant 192 : index
    %96 = vector.load %arg4[%c0_49, %c192] : memref<8x1024xf32, #tpu.memory_space<vmem>>, vector<8x32xf32>
    tpu.vector_store %arg4[%c0_49, %c192], %95 {strides = array<i32>} : memref<8x1024xf32, #tpu.memory_space<vmem>>, vector<8x32xf32>,
    %97 = vector.extract_strided_slice %75 {offsets = [0, 7, 0], sizes = [8, 1, 32], strides = [1, 1, 1]} : vector<8x32x32xf32> to vector<8x1x32xf32>
    %98 = vector.shape_cast %97 : vector<8x1x32xf32> to vector<8x32xf32>
    %c0_50 = arith.constant 0 : index
    %c224 = arith.constant 224 : index
    %99 = vector.load %arg4[%c0_50, %c224] : memref<8x1024xf32, #tpu.memory_space<vmem>>, vector<8x32xf32>
    tpu.vector_store %arg4[%c0_50, %c224], %98 {strides = array<i32>} : memref<8x1024xf32, #tpu.memory_space<vmem>>, vector<8x32xf32>,
    %100 = vector.extract_strided_slice %75 {offsets = [0, 8, 0], sizes = [8, 1, 32], strides = [1, 1, 1]} : vector<8x32x32xf32> to vector<8x1x32xf32>
    %101 = vector.shape_cast %100 : vector<8x1x32xf32> to vector<8x32xf32>
    %c0_51 = arith.constant 0 : index
    %c256 = arith.constant 256 : index
    %102 = vector.load %arg4[%c0_51, %c256] : memref<8x1024xf32, #tpu.memory_space<vmem>>, vector<8x32xf32>
    tpu.vector_store %arg4[%c0_51, %c256], %101 {strides = array<i32>} : memref<8x1024xf32, #tpu.memory_space<vmem>>, vector<8x32xf32>,
    %103 = vector.extract_strided_slice %75 {offsets = [0, 9, 0], sizes = [8, 1, 32], strides = [1, 1, 1]} : vector<8x32x32xf32> to vector<8x1x32xf32>
    %104 = vector.shape_cast %103 : vector<8x1x32xf32> to vector<8x32xf32>
    %c0_52 = arith.constant 0 : index
    %c288 = arith.constant 288 : index
    %105 = vector.load %arg4[%c0_52, %c288] : memref<8x1024xf32, #tpu.memory_space<vmem>>, vector<8x32xf32>
    tpu.vector_store %arg4[%c0_52, %c288], %104 {strides = array<i32>} : memref<8x1024xf32, #tpu.memory_space<vmem>>, vector<8x32xf32>,
    %106 = vector.extract_strided_slice %75 {offsets = [0, 10, 0], sizes = [8, 1, 32], strides = [1, 1, 1]} : vector<8x32x32xf32> to vector<8x1x32xf32>
    %107 = vector.shape_cast %106 : vector<8x1x32xf32> to vector<8x32xf32>
    %c0_53 = arith.constant 0 : index
    %c320 = arith.constant 320 : index
    %108 = vector.load %arg4[%c0_53, %c320] : memref<8x1024xf32, #tpu.memory_space<vmem>>, vector<8x32xf32>
    tpu.vector_store %arg4[%c0_53, %c320], %107 {strides = array<i32>} : memref<8x1024xf32, #tpu.memory_space<vmem>>, vector<8x32xf32>,
    %109 = vector.extract_strided_slice %75 {offsets = [0, 11, 0], sizes = [8, 1, 32], strides = [1, 1, 1]} : vector<8x32x32xf32> to vector<8x1x32xf32>
    %110 = vector.shape_cast %109 : vector<8x1x32xf32> to vector<8x32xf32>
    %c0_54 = arith.constant 0 : index
    %c352 = arith.constant 352 : index
    %111 = vector.load %arg4[%c0_54, %c352] : memref<8x1024xf32, #tpu.memory_space<vmem>>, vector<8x32xf32>
    tpu.vector_store %arg4[%c0_54, %c352], %110 {strides = array<i32>} : memref<8x1024xf32, #tpu.memory_space<vmem>>, vector<8x32xf32>,
    %112 = vector.extract_strided_slice %75 {offsets = [0, 12, 0], sizes = [8, 1, 32], strides = [1, 1, 1]} : vector<8x32x32xf32> to vector<8x1x32xf32>
    %113 = vector.shape_cast %112 : vector<8x1x32xf32> to vector<8x32xf32>
    %c0_55 = arith.constant 0 : index
    %c384 = arith.constant 384 : index
    %114 = vector.load %arg4[%c0_55, %c384] : memref<8x1024xf32, #tpu.memory_space<vmem>>, vector<8x32xf32>
    tpu.vector_store %arg4[%c0_55, %c384], %113 {strides = array<i32>} : memref<8x1024xf32, #tpu.memory_space<vmem>>, vector<8x32xf32>,
    %115 = vector.extract_strided_slice %75 {offsets = [0, 13, 0], sizes = [8, 1, 32], strides = [1, 1, 1]} : vector<8x32x32xf32> to vector<8x1x32xf32>
    %116 = vector.shape_cast %115 : vector<8x1x32xf32> to vector<8x32xf32>
    %c0_56 = arith.constant 0 : index
    %c416 = arith.constant 416 : index
    %117 = vector.load %arg4[%c0_56, %c416] : memref<8x1024xf32, #tpu.memory_space<vmem>>, vector<8x32xf32>
    tpu.vector_store %arg4[%c0_56, %c416], %116 {strides = array<i32>} : memref<8x1024xf32, #tpu.memory_space<vmem>>, vector<8x32xf32>,
    %118 = vector.extract_strided_slice %75 {offsets = [0, 14, 0], sizes = [8, 1, 32], strides = [1, 1, 1]} : vector<8x32x32xf32> to vector<8x1x32xf32>
    %119 = vector.shape_cast %118 : vector<8x1x32xf32> to vector<8x32xf32>
    %c0_57 = arith.constant 0 : index
    %c448 = arith.constant 448 : index
    %120 = vector.load %arg4[%c0_57, %c448] : memref<8x1024xf32, #tpu.memory_space<vmem>>, vector<8x32xf32>
    tpu.vector_store %arg4[%c0_57, %c448], %119 {strides = array<i32>} : memref<8x1024xf32, #tpu.memory_space<vmem>>, vector<8x32xf32>,
    %121 = vector.extract_strided_slice %75 {offsets = [0, 15, 0], sizes = [8, 1, 32], strides = [1, 1, 1]} : vector<8x32x32xf32> to vector<8x1x32xf32>
    %122 = vector.shape_cast %121 : vector<8x1x32xf32> to vector<8x32xf32>
    %c0_58 = arith.constant 0 : index
    %c480 = arith.constant 480 : index
    %123 = vector.load %arg4[%c0_58, %c480] : memref<8x1024xf32, #tpu.memory_space<vmem>>, vector<8x32xf32>
    tpu.vector_store %arg4[%c0_58, %c480], %122 {strides = array<i32>} : memref<8x1024xf32, #tpu.memory_space<vmem>>, vector<8x32xf32>,
    %124 = vector.extract_strided_slice %75 {offsets = [0, 16, 0], sizes = [8, 1, 32], strides = [1, 1, 1]} : vector<8x32x32xf32> to vector<8x1x32xf32>
    %125 = vector.shape_cast %124 : vector<8x1x32xf32> to vector<8x32xf32>
    %c0_59 = arith.constant 0 : index
    %c512 = arith.constant 512 : index
    %126 = vector.load %arg4[%c0_59, %c512] : memref<8x1024xf32, #tpu.memory_space<vmem>>, vector<8x32xf32>
    tpu.vector_store %arg4[%c0_59, %c512], %125 {strides = array<i32>} : memref<8x1024xf32, #tpu.memory_space<vmem>>, vector<8x32xf32>,
    %127 = vector.extract_strided_slice %75 {offsets = [0, 17, 0], sizes = [8, 1, 32], strides = [1, 1, 1]} : vector<8x32x32xf32> to vector<8x1x32xf32>
    %128 = vector.shape_cast %127 : vector<8x1x32xf32> to vector<8x32xf32>
    %c0_60 = arith.constant 0 : index
    %c544 = arith.constant 544 : index
    %129 = vector.load %arg4[%c0_60, %c544] : memref<8x1024xf32, #tpu.memory_space<vmem>>, vector<8x32xf32>
    tpu.vector_store %arg4[%c0_60, %c544], %128 {strides = array<i32>} : memref<8x1024xf32, #tpu.memory_space<vmem>>, vector<8x32xf32>,
    %130 = vector.extract_strided_slice %75 {offsets = [0, 18, 0], sizes = [8, 1, 32], strides = [1, 1, 1]} : vector<8x32x32xf32> to vector<8x1x32xf32>
    %131 = vector.shape_cast %130 : vector<8x1x32xf32> to vector<8x32xf32>
    %c0_61 = arith.constant 0 : index
    %c576 = arith.constant 576 : index
    %132 = vector.load %arg4[%c0_61, %c576] : memref<8x1024xf32, #tpu.memory_space<vmem>>, vector<8x32xf32>
    tpu.vector_store %arg4[%c0_61, %c576], %131 {strides = array<i32>} : memref<8x1024xf32, #tpu.memory_space<vmem>>, vector<8x32xf32>,
    %133 = vector.extract_strided_slice %75 {offsets = [0, 19, 0], sizes = [8, 1, 32], strides = [1, 1, 1]} : vector<8x32x32xf32> to vector<8x1x32xf32>
    %134 = vector.shape_cast %133 : vector<8x1x32xf32> to vector<8x32xf32>
    %c0_62 = arith.constant 0 : index
    %c608 = arith.constant 608 : index
    %135 = vector.load %arg4[%c0_62, %c608] : memref<8x1024xf32, #tpu.memory_space<vmem>>, vector<8x32xf32>
    tpu.vector_store %arg4[%c0_62, %c608], %134 {strides = array<i32>} : memref<8x1024xf32, #tpu.memory_space<vmem>>, vector<8x32xf32>,
    %136 = vector.extract_strided_slice %75 {offsets = [0, 20, 0], sizes = [8, 1, 32], strides = [1, 1, 1]} : vector<8x32x32xf32> to vector<8x1x32xf32>
    %137 = vector.shape_cast %136 : vector<8x1x32xf32> to vector<8x32xf32>
    %c0_63 = arith.constant 0 : index
    %c640 = arith.constant 640 : index
    %138 = vector.load %arg4[%c0_63, %c640] : memref<8x1024xf32, #tpu.memory_space<vmem>>, vector<8x32xf32>
    tpu.vector_store %arg4[%c0_63, %c640], %137 {strides = array<i32>} : memref<8x1024xf32, #tpu.memory_space<vmem>>, vector<8x32xf32>,
    %139 = vector.extract_strided_slice %75 {offsets = [0, 21, 0], sizes = [8, 1, 32], strides = [1, 1, 1]} : vector<8x32x32xf32> to vector<8x1x32xf32>
    %140 = vector.shape_cast %139 : vector<8x1x32xf32> to vector<8x32xf32>
    %c0_64 = arith.constant 0 : index
    %c672 = arith.constant 672 : index
    %141 = vector.load %arg4[%c0_64, %c672] : memref<8x1024xf32, #tpu.memory_space<vmem>>, vector<8x32xf32>
    tpu.vector_store %arg4[%c0_64, %c672], %140 {strides = array<i32>} : memref<8x1024xf32, #tpu.memory_space<vmem>>, vector<8x32xf32>,
    %142 = vector.extract_strided_slice %75 {offsets = [0, 22, 0], sizes = [8, 1, 32], strides = [1, 1, 1]} : vector<8x32x32xf32> to vector<8x1x32xf32>
    %143 = vector.shape_cast %142 : vector<8x1x32xf32> to vector<8x32xf32>
    %c0_65 = arith.constant 0 : index
    %c704 = arith.constant 704 : index
    %144 = vector.load %arg4[%c0_65, %c704] : memref<8x1024xf32, #tpu.memory_space<vmem>>, vector<8x32xf32>
    tpu.vector_store %arg4[%c0_65, %c704], %143 {strides = array<i32>} : memref<8x1024xf32, #tpu.memory_space<vmem>>, vector<8x32xf32>,
    %145 = vector.extract_strided_slice %75 {offsets = [0, 23, 0], sizes = [8, 1, 32], strides = [1, 1, 1]} : vector<8x32x32xf32> to vector<8x1x32xf32>
    %146 = vector.shape_cast %145 : vector<8x1x32xf32> to vector<8x32xf32>
    %c0_66 = arith.constant 0 : index
    %c736 = arith.constant 736 : index
    %147 = vector.load %arg4[%c0_66, %c736] : memref<8x1024xf32, #tpu.memory_space<vmem>>, vector<8x32xf32>
    tpu.vector_store %arg4[%c0_66, %c736], %146 {strides = array<i32>} : memref<8x1024xf32, #tpu.memory_space<vmem>>, vector<8x32xf32>,
    %148 = vector.extract_strided_slice %75 {offsets = [0, 24, 0], sizes = [8, 1, 32], strides = [1, 1, 1]} : vector<8x32x32xf32> to vector<8x1x32xf32>
    %149 = vector.shape_cast %148 : vector<8x1x32xf32> to vector<8x32xf32>
    %c0_67 = arith.constant 0 : index
    %c768 = arith.constant 768 : index
    %150 = vector.load %arg4[%c0_67, %c768] : memref<8x1024xf32, #tpu.memory_space<vmem>>, vector<8x32xf32>
    tpu.vector_store %arg4[%c0_67, %c768], %149 {strides = array<i32>} : memref<8x1024xf32, #tpu.memory_space<vmem>>, vector<8x32xf32>,
    %151 = vector.extract_strided_slice %75 {offsets = [0, 25, 0], sizes = [8, 1, 32], strides = [1, 1, 1]} : vector<8x32x32xf32> to vector<8x1x32xf32>
    %152 = vector.shape_cast %151 : vector<8x1x32xf32> to vector<8x32xf32>
    %c0_68 = arith.constant 0 : index
    %c800 = arith.constant 800 : index
    %153 = vector.load %arg4[%c0_68, %c800] : memref<8x1024xf32, #tpu.memory_space<vmem>>, vector<8x32xf32>
    tpu.vector_store %arg4[%c0_68, %c800], %152 {strides = array<i32>} : memref<8x1024xf32, #tpu.memory_space<vmem>>, vector<8x32xf32>,
    %154 = vector.extract_strided_slice %75 {offsets = [0, 26, 0], sizes = [8, 1, 32], strides = [1, 1, 1]} : vector<8x32x32xf32> to vector<8x1x32xf32>
    %155 = vector.shape_cast %154 : vector<8x1x32xf32> to vector<8x32xf32>
    %c0_69 = arith.constant 0 : index
    %c832 = arith.constant 832 : index
    %156 = vector.load %arg4[%c0_69, %c832] : memref<8x1024xf32, #tpu.memory_space<vmem>>, vector<8x32xf32>
    tpu.vector_store %arg4[%c0_69, %c832], %155 {strides = array<i32>} : memref<8x1024xf32, #tpu.memory_space<vmem>>, vector<8x32xf32>,
    %157 = vector.extract_strided_slice %75 {offsets = [0, 27, 0], sizes = [8, 1, 32], strides = [1, 1, 1]} : vector<8x32x32xf32> to vector<8x1x32xf32>
    %158 = vector.shape_cast %157 : vector<8x1x32xf32> to vector<8x32xf32>
    %c0_70 = arith.constant 0 : index
    %c864 = arith.constant 864 : index
    %159 = vector.load %arg4[%c0_70, %c864] : memref<8x1024xf32, #tpu.memory_space<vmem>>, vector<8x32xf32>
    tpu.vector_store %arg4[%c0_70, %c864], %158 {strides = array<i32>} : memref<8x1024xf32, #tpu.memory_space<vmem>>, vector<8x32xf32>,
    %160 = vector.extract_strided_slice %75 {offsets = [0, 28, 0], sizes = [8, 1, 32], strides = [1, 1, 1]} : vector<8x32x32xf32> to vector<8x1x32xf32>
    %161 = vector.shape_cast %160 : vector<8x1x32xf32> to vector<8x32xf32>
    %c0_71 = arith.constant 0 : index
    %c896 = arith.constant 896 : index
    %162 = vector.load %arg4[%c0_71, %c896] : memref<8x1024xf32, #tpu.memory_space<vmem>>, vector<8x32xf32>
    tpu.vector_store %arg4[%c0_71, %c896], %161 {strides = array<i32>} : memref<8x1024xf32, #tpu.memory_space<vmem>>, vector<8x32xf32>,
    %163 = vector.extract_strided_slice %75 {offsets = [0, 29, 0], sizes = [8, 1, 32], strides = [1, 1, 1]} : vector<8x32x32xf32> to vector<8x1x32xf32>
    %164 = vector.shape_cast %163 : vector<8x1x32xf32> to vector<8x32xf32>
    %c0_72 = arith.constant 0 : index
    %c928 = arith.constant 928 : index
    %165 = vector.load %arg4[%c0_72, %c928] : memref<8x1024xf32, #tpu.memory_space<vmem>>, vector<8x32xf32>
    tpu.vector_store %arg4[%c0_72, %c928], %164 {strides = array<i32>} : memref<8x1024xf32, #tpu.memory_space<vmem>>, vector<8x32xf32>,
    %166 = vector.extract_strided_slice %75 {offsets = [0, 30, 0], sizes = [8, 1, 32], strides = [1, 1, 1]} : vector<8x32x32xf32> to vector<8x1x32xf32>
    %167 = vector.shape_cast %166 : vector<8x1x32xf32> to vector<8x32xf32>
    %c0_73 = arith.constant 0 : index
    %c960 = arith.constant 960 : index
    %168 = vector.load %arg4[%c0_73, %c960] : memref<8x1024xf32, #tpu.memory_space<vmem>>, vector<8x32xf32>
    tpu.vector_store %arg4[%c0_73, %c960], %167 {strides = array<i32>} : memref<8x1024xf32, #tpu.memory_space<vmem>>, vector<8x32xf32>,
    %169 = vector.extract_strided_slice %75 {offsets = [0, 31, 0], sizes = [8, 1, 32], strides = [1, 1, 1]} : vector<8x32x32xf32> to vector<8x1x32xf32>
    %170 = vector.shape_cast %169 : vector<8x1x32xf32> to vector<8x32xf32>
    %c0_74 = arith.constant 0 : index
    %c992 = arith.constant 992 : index
    %171 = vector.load %arg4[%c0_74, %c992] : memref<8x1024xf32, #tpu.memory_space<vmem>>, vector<8x32xf32>
    tpu.vector_store %arg4[%c0_74, %c992], %170 {strides = array<i32>} : memref<8x1024xf32, #tpu.memory_space<vmem>>, vector<8x32xf32>,
    return
  }
  func.func @transform_0(%arg0: i32) -> (i32, i32) {
    %c0_i32 = arith.constant 0 : i32
    %c0_i32_0 = arith.constant 0 : i32
    %c0_i32_1 = arith.constant 0 : i32
    return %c0_i32, %c0_i32_0 : i32, i32
  }
  func.func @transform_1(%arg0: i32) -> (i32, i32) {
    %c0_i32 = arith.constant 0 : i32
    %c0_i32_0 = arith.constant 0 : i32
    %c0_i32_1 = arith.constant 0 : i32
    return %c0_i32, %c0_i32_0 : i32, i32
  }
  func.func @transform_2(%arg0: i32) -> (i32, i32) {
    %c0_i32 = arith.constant 0 : i32
    %c0_i32_0 = arith.constant 0 : i32
    return %arg0, %c0_i32 : i32, i32
  }
  func.func @transform_3(%arg0: i32) -> (i32, i32) {
    %c0_i32 = arith.constant 0 : i32
    %c0_i32_0 = arith.constant 0 : i32
    return %arg0, %c0_i32 : i32, i32
  }
}

</mosaic_0001>

<bundles_post_ra>
// kernel: interpolate.1
= control target key start
LH: loop header
LB: loop body
LE: loop exit
PB: predicated region body
PF: predicated region fallthrough
CT: control target
= control target key end

     0   :  { %vm31_vm0 = vcmask 122880   ;;  %s2051_s14 = smov 112   ;;  %s2052_s15 = smov 96   ;;  %vm801_vm1 = vcmask 130048   ;;  %vm1391_vm2 = vcmask 1041409   ;;  %vm1394_vm3 = vcmask 1042434   ;;  %s3392_s2 = inlined_call_operand.vmem [shape: f32[8,256], index: 2, kind: input, shape index: {}]   ;;  %s3393_s0 = inlined_call_operand.vmem [shape: f32[16,32], index: 0, kind: input, shape index: {}, may-alias: {0,1}]   ;;  %s3394_s1 = inlined_call_operand.vmem [shape: f32[16,32], index: 1, kind: input, shape index: {}, may-alias: {0,1}]   ;;  %s3395_s3 = inlined_call_operand.vmem [shape: f32[8,1024], index: 3, kind: output, shape index: {}]  }
   0x1   :  { %v14_v0 = vld [vmem:[%s3392_s2] sm:$0xff]  ;;  %v2119_v16 = vld [vmem:[%s3392_s2 + $0x8] sm:$0xff]  ;;  %s2053_s2 = smov 80   ;;  %s2054_s18 = smov 64   ;;  %vm1397_vm4 = vcmask 1043459   ;;  %vm1400_vm5 = vcmask 1044484  }
   0x2   :  { %v40_v1 = vperm.slane %v14_v0, 0  ;;  %v20_v2 = vrot.slane %v14_v0, 4  ;;  %32 = vst.msk [vmem:[#allocation2] sm:$0x1] %vm31_vm0, %v14_v0  ;;  %v18_v3 = vrot.slane %v14_v0, 2  ;;  %v17_v6 = vrot.slane %v14_v0, 1 }
   0x3   :  { %v21_v7 = vrot.slane %v14_v0, 5  ;;  %v19_v8 = vrot.slane %v14_v0, 3  ;;  %v22_v9 = vrot.slane %v14_v0, 6  ;;  %v23_v11 = vrot.slane %v14_v0, 7  ;;  %287 = vst.msk [vmem:[#allocation2 + $0x8] sm:$0x1] %vm31_vm0, %v2119_v16 }
   0x4   :  { %48 = vrot.lane.b32.xlu0 %v40_v1, %s2051_s14  ;;  %v2083_v4 = vperm.slane %v20_v2, 0  ;;  %36 = vst.msk [vmem:[#allocation2 + $0x40] sm:$0x1] %vm31_vm0, %v20_v2  ;;  %v2086_v5 = vperm.slane %v18_v3, 0  ;;  %v41_v10 = vperm.slane %v17_v6, 0  ;;  %s2055_s19 = smov 48  }
   0x5   :  { %34 = vst.msk [vmem:[#allocation2 + $0x20] sm:$0x1] %vm31_vm0, %v18_v3  ;;  %v2097_v12 = vperm.slane %v21_v7, 0  ;;  %v2099_v13 = vperm.slane %v19_v8, 0  ;;  %v2107_v14 = vperm.slane %v22_v9, 0  ;;  %v2109_v15 = vperm.slane %v23_v11, 0 }
   0x6   :  { %56 = vrot.lane.b32.xlu2 %v2083_v4, %s2051_s14  ;;  %52 = vrot.lane.b32.xlu1 %v2086_v5, %s2051_s14  ;;  %33 = vst.msk [vmem:[#allocation2 + $0x10] sm:$0x1] %vm31_vm0, %v17_v6  ;;  %v295_v17 = vperm.slane %v2119_v16, 0  ;;  %v273_v18 = vrot.slane %v2119_v16, 1  ;;  %s2056_s20 = smov 32   ;;  %s2057_s21 = smov 16  }
   0x7   :  { %37 = vst.msk [vmem:[#allocation2 + $0x50] sm:$0x1] %vm31_vm0, %v21_v7  ;;  %v274_v19 = vrot.slane %v2119_v16, 2  ;;  %v275_v28 = vrot.slane %v2119_v16, 3  ;;  %v278_v38 = vrot.slane %v2119_v16, 6  ;;  %v276_v43 = vrot.slane %v2119_v16, 4 }
   0x8   :  { %35 = vst.msk [vmem:[#allocation2 + $0x30] sm:$0x1] %vm31_vm0, %v19_v8  ;;  %v296_v20 = vperm.slane %v273_v18, 0  ;;  %vm1403_vm6 = vcmask 1045509   ;;  %vm1406_vm7 = vcmask 1046534   ;;  %vm1409_vm8 = vcmask 1047559  }
   0x9   :  { %38 = vst.msk [vmem:[#allocation2 + $0x60] sm:$0x1] %vm31_vm0, %v22_v9  ;;  %v297_v26 = vperm.slane %v274_v19, 0  ;;  %v298_v42 = vperm.slane %v275_v28, 0  ;;  %v2228_v53 = vperm.slane %v278_v38, 0  ;;  %v2236_v58 = vperm.slane %v276_v43, 0 }
   0xa   :  { %39 = vst.msk [vmem:[#allocation2 + $0x70] sm:$0x1] %vm31_vm0, %v23_v11  ;;  %vm1412_vm9 = vcmask 261120   ;;  %vm1431_vm10 = vcmask 523520   ;;  %vm1450_vm11 = vcmask 785920   ;;  %vm1469_vm12 = vcmask 1048320  }
   0xb   :  { %288 = vst.msk [vmem:[#allocation2 + $0x18] sm:$0x1] %vm31_vm0, %v273_v18 }
   0xc   :  { %50 = vrot.lane.b32.xlu0 %v41_v10, %s2051_s14  ;;  %289 = vst.msk [vmem:[#allocation2 + $0x28] sm:$0x1] %vm31_vm0, %v274_v19 }
   0xd   :  { %290 = vst.msk [vmem:[#allocation2 + $0x38] sm:$0x1] %vm31_vm0, %v275_v28 }
   0xe   :  { %58 = vrot.lane.b32.xlu2 %v2097_v12, %s2051_s14  ;;  %54 = vrot.lane.b32.xlu1 %v2099_v13, %s2051_s14  ;;  %293 = vst.msk [vmem:[#allocation2 + $0x68] sm:$0x1] %vm31_vm0, %v278_v38 }
   0xf   :  { %291 = vst.msk [vmem:[#allocation2 + $0x48] sm:$0x1] %vm31_vm0, %v276_v43 }
  0x14   :  { %60 = vrot.lane.b32.xlu0 %v2107_v14, %s2051_s14 }
  0x16   :  { %80 = vrot.lane.b32.xlu2 %v40_v1, %s2052_s15  ;;  %62 = vrot.lane.b32.xlu1 %v2109_v15, %s2051_s14 }
  0x1c   :  { %82 = vrot.lane.b32.xlu0 %v41_v10, %s2052_s15 }
  0x1e   :  { %86 = vrot.lane.b32.xlu2 %v2099_v13, %s2052_s15  ;;  %84 = vrot.lane.b32.xlu1 %v2086_v5, %s2052_s15 }
  0x24   :  { %88 = vrot.lane.b32.xlu0 %v2083_v4, %s2052_s15 }
  0x26   :  { %92 = vrot.lane.b32.xlu2 %v2107_v14, %s2052_s15  ;;  %90 = vrot.lane.b32.xlu1 %v2097_v12, %s2052_s15 }
  0x2c   :  { %94 = vrot.lane.b32.xlu0 %v2109_v15, %s2052_s15 }
  0x2e   :  { %112 = vrot.lane.b32.xlu1 %v40_v1, %s2053_s2  ;;  %114 = vrot.lane.b32.xlu2 %v41_v10, %s2053_s2 }
  0x34   :  { %116 = vrot.lane.b32.xlu0 %v2086_v5, %s2053_s2 }
  0x36   :  { %144 = vrot.lane.b32.xlu1 %v40_v1, %s2054_s18  ;;  %176 = vrot.lane.b32.xlu2 %v40_v1, %s2055_s19 }
  0x3c   :  { %208 = vrot.lane.b32.xlu0 %v40_v1, %s2056_s20 }
  0x3e   :  { %240 = vrot.lane.b32.xlu1 %v40_v1, %s2057_s21  ;;  %303 = vrot.lane.b32.xlu2 %v295_v17, %s2051_s14 }
  0x44   :  { %335 = vrot.lane.b32.xlu0 %v295_v17, %s2052_s15 }
  0x46   :  { %367 = vrot.lane.b32.xlu1 %v295_v17, %s2053_s2  ;;  %399 = vrot.lane.b32.xlu2 %v295_v17, %s2054_s18 }
  0x4c   :  { %431 = vrot.lane.b32.xlu0 %v295_v17, %s2055_s19 }
  0x4e   :  { %463 = vrot.lane.b32.xlu1 %v295_v17, %s2056_s20  ;;  %495 = vrot.lane.b32.xlu2 %v295_v17, %s2057_s21 }
  0x54   :  { %146 = vrot.lane.b32.xlu0 %v41_v10, %s2054_s18 }
  0x56   :  { %178 = vrot.lane.b32.xlu1 %v41_v10, %s2055_s19  ;;  %210 = vrot.lane.b32.xlu2 %v41_v10, %s2056_s20 }
  0x5c   :  { %242 = vrot.lane.b32.xlu0 %v41_v10, %s2057_s21 }
  0x5e   :  { %305 = vrot.lane.b32.xlu1 %v296_v20, %s2051_s14  ;;  %337 = vrot.lane.b32.xlu2 %v296_v20, %s2052_s15 }
  0x60   :  { %v57_v21 = vpop.permute.xlu2 %56 }
  0x61   :  { %76 = vst.msk [vmem:[#allocation2 + $0x41] sm:$0x1] %vm31_vm0, %v57_v21 }
  0x64   :  { %369 = vrot.lane.b32.xlu0 %v296_v20, %s2053_s2 }
  0x66   :  { %401 = vrot.lane.b32.xlu1 %v296_v20, %s2054_s18  ;;  %433 = vrot.lane.b32.xlu2 %v296_v20, %s2055_s19 }
  0x68   :  { %v59_v22 = vpop.permute.xlu2 %58 }
  0x69   :  { %77 = vst.msk [vmem:[#allocation2 + $0x51] sm:$0x1] %vm31_vm0, %v59_v22 }
  0x6c   :  { %465 = vrot.lane.b32.xlu0 %v296_v20, %s2056_s20 }
  0x6e   :  { %497 = vrot.lane.b32.xlu1 %v296_v20, %s2057_s21  ;;  %148 = vrot.lane.b32.xlu2 %v2086_v5, %s2054_s18 }
  0x70   :  { %v81_v23 = vpop.permute.xlu2 %80 }
  0x71   :  { %104 = vst.msk [vmem:[#allocation2 + $0x2] sm:$0x1] %vm31_vm0, %v81_v23 }
  0x74   :  { %180 = vrot.lane.b32.xlu0 %v2086_v5, %s2055_s19 }
  0x76   :  { %v49_v24 = vpop.permute.xlu0 %48  ;;  %212 = vrot.lane.b32.xlu1 %v2086_v5, %s2056_s20  ;;  %244 = vrot.lane.b32.xlu2 %v2086_v5, %s2057_s21 }
  0x77   :  { %72 = vst.msk [vmem:[#allocation2 + $0x1] sm:$0x1] %vm31_vm0, %v49_v24 }
  0x78   :  { %v53_v25 = vpop.permute.xlu1 %52  ;;  %v87_v27 = vpop.permute.xlu2 %86 }
  0x79   :  { %74 = vst.msk [vmem:[#allocation2 + $0x21] sm:$0x1] %vm31_vm0, %v53_v25 }
  0x7a   :  { %107 = vst.msk [vmem:[#allocation2 + $0x32] sm:$0x1] %vm31_vm0, %v87_v27 }
  0x7c   :  { %307 = vrot.lane.b32.xlu0 %v297_v26, %s2051_s14 }
  0x7e   :  { %339 = vrot.lane.b32.xlu1 %v297_v26, %s2052_s15  ;;  %371 = vrot.lane.b32.xlu2 %v297_v26, %s2053_s2  ;;  %v51_v29 = vpop.permute.xlu0 %50 }
  0x7f   :  { %73 = vst.msk [vmem:[#allocation2 + $0x11] sm:$0x1] %vm31_vm0, %v51_v29 }
  0x80   :  { %v55_v30 = vpop.permute.xlu1 %54  ;;  %v93_v31 = vpop.permute.xlu2 %92 }
  0x81   :  { %75 = vst.msk [vmem:[#allocation2 + $0x31] sm:$0x1] %vm31_vm0, %v55_v30 }
  0x82   :  { %110 = vst.msk [vmem:[#allocation2 + $0x62] sm:$0x1] %vm31_vm0, %v93_v31 }
  0x84   :  { %403 = vrot.lane.b32.xlu0 %v297_v26, %s2054_s18 }
  0x86   :  { %435 = vrot.lane.b32.xlu1 %v297_v26, %s2055_s19  ;;  %467 = vrot.lane.b32.xlu2 %v297_v26, %s2056_s20  ;;  %v61_v32 = vpop.permute.xlu0 %60 }
  0x87   :  { %78 = vst.msk [vmem:[#allocation2 + $0x61] sm:$0x1] %vm31_vm0, %v61_v32 }
  0x88   :  { %v63_v33 = vpop.permute.xlu1 %62  ;;  %v115_v34 = vpop.permute.xlu2 %114 }
  0x89   :  { %79 = vst.msk [vmem:[#allocation2 + $0x71] sm:$0x1] %vm31_vm0, %v63_v33 }
  0x8a   :  { %137 = vst.msk [vmem:[#allocation2 + $0x13] sm:$0x1] %vm31_vm0, %v115_v34 }
  0x8c   :  { %499 = vrot.lane.b32.xlu0 %v297_v26, %s2057_s21 }
  0x8e   :  { %118 = vrot.lane.b32.xlu1 %v2099_v13, %s2053_s2  ;;  %150 = vrot.lane.b32.xlu2 %v2099_v13, %s2054_s18  ;;  %v83_v35 = vpop.permute.xlu0 %82 }
  0x8f   :  { %105 = vst.msk [vmem:[#allocation2 + $0x12] sm:$0x1] %vm31_vm0, %v83_v35 }
  0x90   :  { %v85_v36 = vpop.permute.xlu1 %84  ;;  %v177_v37 = vpop.permute.xlu2 %176 }
  0x91   :  { %106 = vst.msk [vmem:[#allocation2 + $0x22] sm:$0x1] %vm31_vm0, %v85_v36 }
  0x92   :  { %200 = vst.msk [vmem:[#allocation2 + $0x5] sm:$0x1] %vm31_vm0, %v177_v37 }
  0x96   :  { %214 = vrot.lane.b32.xlu1 %v2099_v13, %s2056_s20  ;;  %246 = vrot.lane.b32.xlu2 %v2099_v13, %s2057_s21  ;;  %v89_v39 = vpop.permute.xlu0 %88 }
  0x97   :  { %108 = vst.msk [vmem:[#allocation2 + $0x42] sm:$0x1] %vm31_vm0, %v89_v39 }
  0x98   :  { %v91_v40 = vpop.permute.xlu1 %90  ;;  %v304_v41 = vpop.permute.xlu2 %303 }
  0x99   :  { %109 = vst.msk [vmem:[#allocation2 + $0x52] sm:$0x1] %vm31_vm0, %v91_v40 }
  0x9a   :  { %327 = vst.msk [vmem:[#allocation2 + $0x9] sm:$0x1] %vm31_vm0, %v304_v41 }
  0x9e   :  { %309 = vrot.lane.b32.xlu1 %v298_v42, %s2051_s14  ;;  %341 = vrot.lane.b32.xlu2 %v298_v42, %s2052_s15  ;;  %v95_v44 = vpop.permute.xlu0 %94 }
  0x9f   :  { %111 = vst.msk [vmem:[#allocation2 + $0x72] sm:$0x1] %vm31_vm0, %v95_v44  ;;  %v279_v44 = vrot.slane %v2119_v16, 7 }
  0xa0   :  { %v113_v45 = vpop.permute.xlu1 %112  ;;  %v400_v46 = vpop.permute.xlu2 %399 }
  0xa1   :  { %136 = vst.msk [vmem:[#allocation2 + $0x3] sm:$0x1] %vm31_vm0, %v113_v45 }
  0xa2   :  { %423 = vst.msk [vmem:[#allocation2 + $0xc] sm:$0x1] %vm31_vm0, %v400_v46 }
  0xa3   :  { %294 = vst.msk [vmem:[#allocation2 + $0x78] sm:$0x1] %vm31_vm0, %v279_v44 }
  0xa6   :  { %373 = vrot.lane.b32.xlu1 %v298_v42, %s2053_s2  ;;  %405 = vrot.lane.b32.xlu2 %v298_v42, %s2054_s18  ;;  %v117_v47 = vpop.permute.xlu0 %116 }
  0xa7   :  { %138 = vst.msk [vmem:[#allocation2 + $0x23] sm:$0x1] %vm31_vm0, %v117_v47 }
  0xa8   :  { %v145_v48 = vpop.permute.xlu1 %144  ;;  %v496_v49 = vpop.permute.xlu2 %495 }
  0xa9   :  { %168 = vst.msk [vmem:[#allocation2 + $0x4] sm:$0x1] %vm31_vm0, %v145_v48 }
  0xaa   :  { %519 = vst.msk [vmem:[#allocation2 + $0xf] sm:$0x1] %vm31_vm0, %v496_v49  ;;  %v2338_v49 = vperm.slane %v279_v44, 0 }
  0xae   :  { %437 = vrot.lane.b32.xlu1 %v298_v42, %s2055_s19  ;;  %469 = vrot.lane.b32.xlu2 %v298_v42, %s2056_s20  ;;  %v209_v50 = vpop.permute.xlu0 %208 }
  0xaf   :  { %232 = vst.msk [vmem:[#allocation2 + $0x6] sm:$0x1] %vm31_vm0, %v209_v50 }
  0xb0   :  { %v241_v51 = vpop.permute.xlu1 %240  ;;  %v211_v52 = vpop.permute.xlu2 %210 }
  0xb1   :  { %264 = vst.msk [vmem:[#allocation2 + $0x7] sm:$0x1] %vm31_vm0, %v241_v51 }
  0xb2   :  { %233 = vst.msk [vmem:[#allocation2 + $0x16] sm:$0x1] %vm31_vm0, %v211_v52  ;;  %v800_v52 = vld [vmem:[%s3393_s0 + $0x8] sm:$0xff] }
  0xb3   :  { %864 = vmatpush.msra.mxu0 %v800_v52  ;;  %2037 = vmatpush.msra.mxu3 %v800_v52 }
  0xb6   :  { %501 = vrot.lane.b32.xlu1 %v298_v42, %s2057_s21  ;;  %347 = vrot.lane.b32.xlu2 %v2228_v53, %s2052_s15  ;;  %v336_v54 = vpop.permute.xlu0 %335 }
  0xb7   :  { %359 = vst.msk [vmem:[#allocation2 + $0xa] sm:$0x1] %vm31_vm0, %v336_v54  ;;  %v799_v54 = vld [vmem:[%s3393_s0] sm:$0xff] }
  0xb8   :  { %v368_v55 = vpop.permute.xlu1 %367  ;;  %v527_v56 = vld [vmem:[#allocation2] sm:$0xff]  ;;  %v338_v57 = vpop.permute.xlu2 %337  ;;  %865 = vmatpush.msra.mxu0 %v799_v54  ;;  %2038 = vmatpush.msra.mxu3 %v799_v54 }
  0xb9   :  { %391 = vst.msk [vmem:[#allocation2 + $0xb] sm:$0x1] %vm31_vm0, %v368_v55  ;;  %543 = vxpose.xlu0.b32.start [1/2] (short) (narrow) %v527_v56, 16 }
  0xba   :  { %360 = vst.msk [vmem:[#allocation2 + $0x1a] sm:$0x1] %vm31_vm0, %v338_v57 }
  0xbe   :  { %124 = vrot.lane.b32.xlu1 %v2107_v14, %s2053_s2  ;;  %407 = vrot.lane.b32.xlu2 %v2236_v58, %s2054_s18  ;;  %v432_v59 = vpop.permute.xlu0 %431 }
  0xbf   :  { %455 = vst.msk [vmem:[#allocation2 + $0xd] sm:$0x1] %vm31_vm0, %v432_v59  ;;  %v277_v59 = vrot.slane %v2119_v16, 5 }
  0xc0   :  { %v464_v60 = vpop.permute.xlu1 %463  ;;  %v434_v61 = vpop.permute.xlu2 %433 }
  0xc1   :  { %487 = vst.msk [vmem:[#allocation2 + $0xe] sm:$0x1] %vm31_vm0, %v464_v60  ;;  %v300_v60 = vperm.slane %v277_v59, 0 }
  0xc2   :  { %456 = vst.msk [vmem:[#allocation2 + $0x1d] sm:$0x1] %vm31_vm0, %v434_v61 }
  0xc3   :  { %292 = vst.msk [vmem:[#allocation2 + $0x58] sm:$0x1] %vm31_vm0, %v277_v59 }
  0xc6   :  { %156 = vrot.lane.b32.xlu1 %v2107_v14, %s2054_s18  ;;  %471 = vrot.lane.b32.xlu2 %v2236_v58, %s2056_s20  ;;  %v147_v62 = vpop.permute.xlu0 %146 }
  0xc7   :  { %169 = vst.msk [vmem:[#allocation2 + $0x14] sm:$0x1] %vm31_vm0, %v147_v62 }
  0xc8   :  { %v179_v63 = vpop.permute.xlu1 %178  ;;  %v528_v0 = vld [vmem:[#allocation2 + $0x8] sm:$0xff]  ;;  %v149_v1 = vpop.permute.xlu2 %148 }
  0xc9   :  { %201 = vst.msk [vmem:[#allocation2 + $0x15] sm:$0x1] %vm31_vm0, %v179_v63  ;;  %544 = vxpose.xlu0.b32.end [2/2] (short) (narrow) %v528_v0, 16 }
  0xca   :  { %170 = vst.msk [vmem:[#allocation2 + $0x24] sm:$0x1] %vm31_vm0, %v149_v1 }
  0xce   :  { %220 = vrot.lane.b32.xlu1 %v2107_v14, %s2056_s20  ;;  %v243_v2 = vpop.permute.xlu0 %242 }
  0xcf   :  { %265 = vst.msk [vmem:[#allocation2 + $0x17] sm:$0x1] %vm31_vm0, %v243_v2 }
  0xd0   :  { %v306_v3 = vpop.permute.xlu1 %305  ;;  %v245_v5 = vpop.permute.xlu2 %244 }
  0xd1   :  { %328 = vst.msk [vmem:[#allocation2 + $0x19] sm:$0x1] %vm31_vm0, %v306_v3 }
  0xd2   :  { %266 = vst.msk [vmem:[#allocation2 + $0x27] sm:$0x1] %vm31_vm0, %v245_v5 }
  0xd6   :  { %252 = vrot.lane.b32.xlu1 %v2107_v14, %s2057_s21  ;;  %v370_v6 = vpop.permute.xlu0 %369  ;;  %v529_v19 = vld [vmem:[#allocation2 + $0x10] sm:$0xff] }
  0xd7   :  { %392 = vst.msk [vmem:[#allocation2 + $0x1b] sm:$0x1] %vm31_vm0, %v370_v6 }
  0xd8   :  { %v402_v7 = vpop.permute.xlu1 %401  ;;  %v372_v8 = vpop.permute.xlu2 %371 }
  0xd9   :  { %424 = vst.msk [vmem:[#allocation2 + $0x1c] sm:$0x1] %vm31_vm0, %v402_v7 }
  0xda   :  { %393 = vst.msk [vmem:[#allocation2 + $0x2b] sm:$0x1] %vm31_vm0, %v372_v8 }
  0xde   :  { %315 = vrot.lane.b32.xlu1 %v2228_v53, %s2051_s14  ;;  %v466_v9 = vpop.permute.xlu0 %465 }
  0xdf   :  { %488 = vst.msk [vmem:[#allocation2 + $0x1e] sm:$0x1] %vm31_vm0, %v466_v9 }
  0xe0   :  { %v498_v10 = vpop.permute.xlu1 %497  ;;  %v468_v11 = vpop.permute.xlu2 %467 }
  0xe1   :  { %520 = vst.msk [vmem:[#allocation2 + $0x1f] sm:$0x1] %vm31_vm0, %v498_v10 }
  0xe2   :  { %489 = vst.msk [vmem:[#allocation2 + $0x2e] sm:$0x1] %vm31_vm0, %v468_v11 }
  0xe6   :  { %379 = vrot.lane.b32.xlu1 %v2228_v53, %s2053_s2  ;;  %v181_v17 = vpop.permute.xlu0 %180 }
  0xe7   :  { %202 = vst.msk [vmem:[#allocation2 + $0x25] sm:$0x1] %vm31_vm0, %v181_v17 }
  0xe8   :  { %v213_v18 = vpop.permute.xlu1 %212  ;;  %v530_v23 = vld [vmem:[#allocation2 + $0x18] sm:$0xff]  ;;  %v151_v33 = vpop.permute.xlu2 %150 }
  0xe9   :  { %234 = vst.msk [vmem:[#allocation2 + $0x26] sm:$0x1] %vm31_vm0, %v213_v18 }
  0xea   :  { %171 = vst.msk [vmem:[#allocation2 + $0x34] sm:$0x1] %vm31_vm0, %v151_v33 }
  0xec   :  { %575 = vxpose.xlu2.b32.start [1/2] (short) (narrow) %v529_v19, 16 }
  0xee   :  { %411 = vrot.lane.b32.xlu1 %v2228_v53, %s2054_s18  ;;  %v308_v20 = vpop.permute.xlu0 %307 }
  0xef   :  { %329 = vst.msk [vmem:[#allocation2 + $0x29] sm:$0x1] %vm31_vm0, %v308_v20 }
  0xf0   :  { %v340_v21 = vpop.permute.xlu1 %339  ;;  %v531_v22 = vld [vmem:[#allocation2 + $0x20] sm:$0xff]  ;;  %v247_v35 = vpop.permute.xlu2 %246 }
  0xf1   :  { %361 = vst.msk [vmem:[#allocation2 + $0x2a] sm:$0x1] %vm31_vm0, %v340_v21  ;;  %607 = vxpose.xlu0.b32.start [1/2] (short) (narrow) %v531_v22, 16 }
  0xf2   :  { %267 = vst.msk [vmem:[#allocation2 + $0x37] sm:$0x1] %vm31_vm0, %v247_v35 }
  0xf4   :  { %576 = vxpose.xlu2.b32.end [2/2] (short) (narrow) %v530_v23, 16 }
  0xf6   :  { %443 = vrot.lane.b32.xlu1 %v2228_v53, %s2055_s19  ;;  %v404_v24 = vpop.permute.xlu0 %403 }
  0xf7   :  { %425 = vst.msk [vmem:[#allocation2 + $0x2c] sm:$0x1] %vm31_vm0, %v404_v24 }
  0xf8   :  { %v436_v25 = vpop.permute.xlu1 %435  ;;  %v342_v37 = vpop.permute.xlu2 %341 }
  0xf9   :  { %457 = vst.msk [vmem:[#allocation2 + $0x2d] sm:$0x1] %vm31_vm0, %v436_v25 }
  0xfa   :  { %362 = vst.msk [vmem:[#allocation2 + $0x3a] sm:$0x1] %vm31_vm0, %v342_v37 }
  0xfe   :  { %475 = vrot.lane.b32.xlu1 %v2228_v53, %s2056_s20  ;;  %v500_v26 = vpop.permute.xlu0 %499 }
  0xff   :  { %521 = vst.msk [vmem:[#allocation2 + $0x2f] sm:$0x1] %vm31_vm0, %v500_v26 }
 0x100   :  { %v119_v27 = vpop.permute.xlu1 %118  ;;  %v406_v39 = vpop.permute.xlu2 %405 }
 0x101   :  { %139 = vst.msk [vmem:[#allocation2 + $0x33] sm:$0x1] %vm31_vm0, %v119_v27 }
 0x102   :  { %426 = vst.msk [vmem:[#allocation2 + $0x3c] sm:$0x1] %vm31_vm0, %v406_v39 }
 0x106   :  { %507 = vrot.lane.b32.xlu1 %v2228_v53, %s2057_s21  ;;  %v532_v28 = vld [vmem:[#allocation2 + $0x28] sm:$0xff] }
 0x107   :  { %608 = vxpose.xlu0.b32.end [2/2] (short) (narrow) %v532_v28, 16 }
 0x108   :  { %v215_v29 = vpop.permute.xlu1 %214 }
 0x109   :  { %235 = vst.msk [vmem:[#allocation2 + $0x36] sm:$0x1] %vm31_vm0, %v215_v29 }
 0x10e   :  { %120 = vrot.lane.b32.xlu1 %v2083_v4, %s2053_s2 }
 0x110   :  { %v310_v30 = vpop.permute.xlu1 %309 }
 0x111   :  { %330 = vst.msk [vmem:[#allocation2 + $0x39] sm:$0x1] %vm31_vm0, %v310_v30 }
 0x116   :  { %152 = vrot.lane.b32.xlu1 %v2083_v4, %s2054_s18 }
 0x118   :  { %v374_v31 = vpop.permute.xlu1 %373 }
 0x119   :  { %394 = vst.msk [vmem:[#allocation2 + $0x3b] sm:$0x1] %vm31_vm0, %v374_v31 }
 0x11e   :  { %184 = vrot.lane.b32.xlu1 %v2083_v4, %s2055_s19 }
 0x120   :  { %v438_v32 = vpop.permute.xlu1 %437 }
 0x121   :  { %458 = vst.msk [vmem:[#allocation2 + $0x3d] sm:$0x1] %vm31_vm0, %v438_v32 }
 0x126   :  { %216 = vrot.lane.b32.xlu1 %v2083_v4, %s2056_s20 }
 0x128   :  { %v502_v34 = vpop.permute.xlu1 %501 }
 0x129   :  { %522 = vst.msk [vmem:[#allocation2 + $0x3f] sm:$0x1] %vm31_vm0, %v502_v34 }
 0x12e   :  { %248 = vrot.lane.b32.xlu1 %v2083_v4, %s2057_s21  ;;  %v470_v4 = vpop.permute.xlu2 %469 }
 0x12f   :  { %490 = vst.msk [vmem:[#allocation2 + $0x3e] sm:$0x1] %vm31_vm0, %v470_v4 }
 0x130   :  { %v125_v36 = vpop.permute.xlu1 %124 }
 0x131   :  { %142 = vst.msk [vmem:[#allocation2 + $0x63] sm:$0x1] %vm31_vm0, %v125_v36 }
 0x136   :  { %311 = vrot.lane.b32.xlu1 %v2236_v58, %s2051_s14  ;;  %v348_v51 = vpop.permute.xlu2 %347  ;;  %v534_v20 = vld [vmem:[#allocation2 + $0x38] sm:$0xff] }
 0x137   :  { %365 = vst.msk [vmem:[#allocation2 + $0x6a] sm:$0x1] %vm31_vm0, %v348_v51 }
 0x138   :  { %v157_v38 = vpop.permute.xlu1 %156 }
 0x139   :  { %174 = vst.msk [vmem:[#allocation2 + $0x64] sm:$0x1] %vm31_vm0, %v157_v38 }
 0x13e   :  { %343 = vrot.lane.b32.xlu1 %v2236_v58, %s2052_s15 }
 0x140   :  { %v221_v40 = vpop.permute.xlu1 %220 }
 0x141   :  { %238 = vst.msk [vmem:[#allocation2 + $0x66] sm:$0x1] %vm31_vm0, %v221_v40 }
 0x146   :  { %375 = vrot.lane.b32.xlu1 %v2236_v58, %s2053_s2 }
 0x148   :  { %v253_v41 = vpop.permute.xlu1 %252 }
 0x149   :  { %270 = vst.msk [vmem:[#allocation2 + $0x67] sm:$0x1] %vm31_vm0, %v253_v41 }
 0x14e   :  { %439 = vrot.lane.b32.xlu1 %v2236_v58, %s2055_s19 }
 0x150   :  { %v316_v42 = vpop.permute.xlu1 %315 }
 0x151   :  { %333 = vst.msk [vmem:[#allocation2 + $0x69] sm:$0x1] %vm31_vm0, %v316_v42 }
 0x156   :  { %503 = vrot.lane.b32.xlu1 %v2236_v58, %s2057_s21 }
 0x158   :  { %v380_v43 = vpop.permute.xlu1 %379 }
 0x159   :  { %397 = vst.msk [vmem:[#allocation2 + $0x6b] sm:$0x1] %vm31_vm0, %v380_v43 }
 0x15e   :  { %126 = vrot.lane.b32.xlu1 %v2109_v15, %s2053_s2 }
 0x160   :  { %v412_v45 = vpop.permute.xlu1 %411 }
 0x161   :  { %429 = vst.msk [vmem:[#allocation2 + $0x6c] sm:$0x1] %vm31_vm0, %v412_v45 }
 0x165   :  { %v559_v53 = vpop.trf.xlu0 }
 0x166   :  { %190 = vrot.lane.b32.xlu1 %v2109_v15, %s2055_s19  ;;  %1989 = vmatmul.msk.f32.vlgmr.msra.gmra.mxu0 %vm801_vm1, %v559_v53 }
 0x168   :  { %v444_v46 = vpop.permute.xlu1 %443 }
 0x169   :  { %461 = vst.msk [vmem:[#allocation2 + $0x6d] sm:$0x1] %vm31_vm0, %v444_v46 }
 0x16d   :  { %v560_v57 = vpop.trf.xlu0 }
 0x16e   :  { %222 = vrot.lane.b32.xlu1 %v2109_v15, %s2056_s20  ;;  %1990 = vmatmul.msk.f32.gmra.mxu0 %vm801_vm1, %v560_v57 }
 0x170   :  { %v476_v47 = vpop.permute.xlu1 %475 }
 0x171   :  { %493 = vst.msk [vmem:[#allocation2 + $0x6e] sm:$0x1] %vm31_vm0, %v476_v47 }
 0x175   :  { %182 = vrot.lane.b32.xlu0 %v2099_v13, %s2055_s19 }
 0x176   :  { %254 = vrot.lane.b32.xlu1 %v2109_v15, %s2057_s21 }
 0x178   :  { %v508_v48 = vpop.permute.xlu1 %507 }
 0x179   :  { %525 = vst.msk [vmem:[#allocation2 + $0x6f] sm:$0x1] %vm31_vm0, %v508_v48 }
 0x17d   :  { %188 = vrot.lane.b32.xlu0 %v2107_v14, %s2055_s19 }
 0x17e   :  { %317 = vrot.lane.b32.xlu1 %v2338_v49, %s2051_s14 }
 0x180   :  { %v121_v50 = vpop.permute.xlu1 %120  ;;  %v540_v22 = vld [vmem:[#allocation2 + $0x68] sm:$0xff] }
 0x181   :  { %140 = vst.msk [vmem:[#allocation2 + $0x43] sm:$0x1] %vm31_vm0, %v121_v50 }
 0x185   :  { %158 = vrot.lane.b32.xlu0 %v2109_v15, %s2054_s18  ;;  %v408_v15 = vpop.permute.xlu2 %407 }
 0x186   :  { %349 = vrot.lane.b32.xlu1 %v2338_v49, %s2052_s15  ;;  %427 = vst.msk [vmem:[#allocation2 + $0x4c] sm:$0x1] %vm31_vm0, %v408_v15 }
 0x188   :  { %v153_v13 = vpop.permute.xlu1 %152 }
 0x189   :  { %172 = vst.msk [vmem:[#allocation2 + $0x44] sm:$0x1] %vm31_vm0, %v153_v13 }
 0x18d   :  { %250 = vrot.lane.b32.xlu0 %v2097_v12, %s2057_s21  ;;  %v472_v56 = vpop.permute.xlu2 %471 }
 0x18e   :  { %413 = vrot.lane.b32.xlu1 %v2338_v49, %s2054_s18  ;;  %491 = vst.msk [vmem:[#allocation2 + $0x4e] sm:$0x1] %vm31_vm0, %v472_v56 }
 0x190   :  { %v185_v14 = vpop.permute.xlu1 %184 }
 0x191   :  { %204 = vst.msk [vmem:[#allocation2 + $0x45] sm:$0x1] %vm31_vm0, %v185_v14 }
 0x195   :  { %345 = vrot.lane.b32.xlu0 %v300_v60, %s2052_s15  ;;  %v591_v61 = vpop.trf.xlu2 }
 0x196   :  { %445 = vrot.lane.b32.xlu1 %v2338_v49, %s2055_s19  ;;  %1991 = vmatmul.msk.f32.gmra.mxu0 %vm801_vm1, %v591_v61 }
 0x198   :  { %v217_v55 = vpop.permute.xlu1 %216 }
 0x199   :  { %236 = vst.msk [vmem:[#allocation2 + $0x46] sm:$0x1] %vm31_vm0, %v217_v55 }
 0x19d   :  { %409 = vrot.lane.b32.xlu0 %v300_v60, %s2054_s18  ;;  %v592_v16 = vpop.trf.xlu2 }
 0x19e   :  { %477 = vrot.lane.b32.xlu1 %v2338_v49, %s2056_s20  ;;  %1992 = vmatmul.msk.f32.gmra.mxu0 %vm801_vm1, %v592_v16 }
 0x1a0   :  { %v249_v58 = vpop.permute.xlu1 %248 }
 0x1a1   :  { %268 = vst.msk [vmem:[#allocation2 + $0x47] sm:$0x1] %vm31_vm0, %v249_v58 }
 0x1a3   :  { %v623_v0 = vpop.trf.xlu0 }
 0x1a5   :  { %473 = vrot.lane.b32.xlu0 %v300_v60, %s2056_s20 }
 0x1a6   :  { %509 = vrot.lane.b32.xlu1 %v2338_v49, %s2057_s21  ;;  %1993 = vmatmul.msk.f32.gmra.mxu0 %vm801_vm1, %v623_v0 }
 0x1a8   :  { %v312_v62 = vpop.permute.xlu1 %311  ;;  %v535_v28 = vld [vmem:[#allocation2 + $0x40] sm:$0xff] }
 0x1a9   :  { %331 = vst.msk [vmem:[#allocation2 + $0x49] sm:$0x1] %vm31_vm0, %v312_v62 }
 0x1ab   :  { %v624_v2 = vpop.trf.xlu0 }
 0x1ae   :  { %122 = vrot.lane.b32.xlu1 %v2097_v12, %s2053_s2  ;;  %1994 = vmatmul.msk.f32.gmra.mxu0 %vm801_vm1, %v624_v2  ;;  %v1171_v2 = vld [vmem:[%s3394_s1] sm:$0xff] }
 0x1b0   :  { %v344_v63 = vpop.permute.xlu1 %343 }
 0x1b1   :  { %363 = vst.msk [vmem:[#allocation2 + $0x4a] sm:$0x1] %vm31_vm0, %v344_v63 }
 0x1b6   :  { %154 = vrot.lane.b32.xlu1 %v2097_v12, %s2054_s18 }
 0x1b8   :  { %v376_v1 = vpop.permute.xlu1 %375 }
 0x1b9   :  { %395 = vst.msk [vmem:[#allocation2 + $0x4b] sm:$0x1] %vm31_vm0, %v376_v1  ;;  %v1172_v1 = vld [vmem:[%s3394_s1 + $0x8] sm:$0xff] }
 0x1ba   :  { %2039 = vmatpush.msra.mxu2 %v1172_v1  ;;  %1283 = vmatpush.msra.mxu1 %v1172_v1 }
 0x1bb   :  { %2040 = vmatpush.msrb.mxu3 %v1172_v1 }
 0x1bc   :  { %2041 = vmatpush.msra.mxu2 %v1171_v2  ;;  %1284 = vmatpush.msra.mxu1 %v1171_v2 }
 0x1bd   :  { %2042 = vmatpush.msrb.mxu3 %v1171_v2 }
 0x1be   :  { %186 = vrot.lane.b32.xlu1 %v2097_v12, %s2055_s19 }
 0x1c0   :  { %v440_v3 = vpop.permute.xlu1 %439 }
 0x1c1   :  { %459 = vst.msk [vmem:[#allocation2 + $0x4d] sm:$0x1] %vm31_vm0, %v440_v3 }
 0x1c6   :  { %218 = vrot.lane.b32.xlu1 %v2097_v12, %s2056_s20 }
 0x1c8   :  { %v504_v5 = vpop.permute.xlu1 %503 }
 0x1c9   :  { %523 = vst.msk [vmem:[#allocation2 + $0x4f] sm:$0x1] %vm31_vm0, %v504_v5 }
 0x1ce   :  { %313 = vrot.lane.b32.xlu1 %v300_v60, %s2051_s14 }
 0x1d0   :  { %v127_v6 = vpop.permute.xlu1 %126  ;;  %v536_v30 = vld [vmem:[#allocation2 + $0x48] sm:$0xff] }
 0x1d1   :  { %143 = vst.msk [vmem:[#allocation2 + $0x73] sm:$0x1] %vm31_vm0, %v127_v6 }
 0x1d6   :  { %377 = vrot.lane.b32.xlu1 %v300_v60, %s2053_s2 }
 0x1d8   :  { %v191_v7 = vpop.permute.xlu1 %190 }
 0x1d9   :  { %207 = vst.msk [vmem:[#allocation2 + $0x75] sm:$0x1] %vm31_vm0, %v191_v7 }
 0x1de   :  { %441 = vrot.lane.b32.xlu1 %v300_v60, %s2055_s19 }
 0x1e0   :  { %v223_v8 = vpop.permute.xlu1 %222 }
 0x1e1   :  { %239 = vst.msk [vmem:[#allocation2 + $0x76] sm:$0x1] %vm31_vm0, %v223_v8 }
 0x1e3   :  { %v867_v42 = vpop.f32.mrf.mxu0 }
 0x1e6   :  { %505 = vrot.lane.b32.xlu1 %v300_v60, %s2057_s21 }
 0x1e7   :  { %v183_v12 = vpop.permute.xlu0 %182 }
 0x1e8   :  { %203 = vst.msk [vmem:[#allocation2 + $0x35] sm:$0x1] %vm31_vm0, %v183_v12  ;;  %v255_v9 = vpop.permute.xlu1 %254 }
 0x1e9   :  { %271 = vst.msk [vmem:[#allocation2 + $0x77] sm:$0x1] %vm31_vm0, %v255_v9 }
 0x1eb   :  { %v870_v43 = vpop.f32.mrf.mxu0 }
 0x1ef   :  { %v189_v10 = vpop.permute.xlu0 %188  ;;  %v533_v11 = vld [vmem:[#allocation2 + $0x30] sm:$0xff] }
 0x1f0   :  { %206 = vst.msk [vmem:[#allocation2 + $0x65] sm:$0x1] %vm31_vm0, %v189_v10  ;;  %v318_v17 = vpop.permute.xlu1 %317  ;;  %639 = vxpose.xlu2.b32.start [1/2] (short) (narrow) %v533_v11, 16 }
 0x1f1   :  { %334 = vst.msk [vmem:[#allocation2 + $0x79] sm:$0x1] %vm31_vm0, %v318_v17 }
 0x1f7   :  { %v159_v18 = vpop.permute.xlu0 %158  ;;  %v539_v19 = vld [vmem:[#allocation2 + $0x60] sm:$0xff] }
 0x1f8   :  { %175 = vst.msk [vmem:[#allocation2 + $0x74] sm:$0x1] %vm31_vm0, %v159_v18  ;;  %v350_v21 = vpop.permute.xlu1 %349  ;;  %735 = vxpose.xlu0.b32.start [1/2] (short) (narrow) %v539_v19, 16  ;;  %640 = vxpose.xlu2.b32.end [2/2] (short) (narrow) %v534_v20, 16 }
 0x1f9   :  { %366 = vst.msk [vmem:[#allocation2 + $0x7a] sm:$0x1] %vm31_vm0, %v350_v21 }
 0x1ff   :  { %v251_v27 = vpop.permute.xlu0 %250  ;;  %v541_v45 = vld [vmem:[#allocation2 + $0x70] sm:$0xff] }
 0x200   :  { %v414_v23 = vpop.permute.xlu1 %413  ;;  %736 = vxpose.xlu0.b32.end [2/2] (short) (narrow) %v540_v22, 16  ;;  %269 = vst.msk [vmem:[#allocation2 + $0x57] sm:$0x1] %vm31_vm0, %v251_v27 }
 0x201   :  { %430 = vst.msk [vmem:[#allocation2 + $0x7c] sm:$0x1] %vm31_vm0, %v414_v23 }
 0x207   :  { %v346_v32 = vpop.permute.xlu0 %345 }
 0x208   :  { %v446_v24 = vpop.permute.xlu1 %445  ;;  %364 = vst.msk [vmem:[#allocation2 + $0x5a] sm:$0x1] %vm31_vm0, %v346_v32 }
 0x209   :  { %462 = vst.msk [vmem:[#allocation2 + $0x7d] sm:$0x1] %vm31_vm0, %v446_v24 }
 0x20f   :  { %v410_v34 = vpop.permute.xlu0 %409 }
 0x210   :  { %v478_v25 = vpop.permute.xlu1 %477  ;;  %428 = vst.msk [vmem:[#allocation2 + $0x5c] sm:$0x1] %vm31_vm0, %v410_v34 }
 0x211   :  { %494 = vst.msk [vmem:[#allocation2 + $0x7e] sm:$0x1] %vm31_vm0, %v478_v25 }
 0x213   :  { %v873_v44 = vpop.f32.mrf.mxu0 }
 0x217   :  { %v474_v36 = vpop.permute.xlu0 %473 }
 0x218   :  { %v510_v26 = vpop.permute.xlu1 %509  ;;  %492 = vst.msk [vmem:[#allocation2 + $0x5e] sm:$0x1] %vm31_vm0, %v474_v36 }
 0x219   :  { %526 = vst.msk [vmem:[#allocation2 + $0x7f] sm:$0x1] %vm31_vm0, %v510_v26 }
 0x21b   :  { %671 = vxpose.xlu1.b32.start [1/2] (short) (narrow) %v535_v28, 16  ;;  %v876_v47 = vpop.f32.mrf.mxu0 }
 0x220   :  { %v123_v29 = vpop.permute.xlu1 %122 }
 0x221   :  { %141 = vst.msk [vmem:[#allocation2 + $0x53] sm:$0x1] %vm31_vm0, %v123_v29 }
 0x223   :  { %672 = vxpose.xlu1.b32.end [2/2] (short) (narrow) %v536_v30, 16  ;;  %v879_v50 = vpop.f32.mrf.mxu0 }
 0x228   :  { %v155_v31 = vpop.permute.xlu1 %154 }
 0x229   :  { %173 = vst.msk [vmem:[#allocation2 + $0x54] sm:$0x1] %vm31_vm0, %v155_v31 }
 0x230   :  { %v187_v33 = vpop.permute.xlu1 %186 }
 0x231   :  { %205 = vst.msk [vmem:[#allocation2 + $0x55] sm:$0x1] %vm31_vm0, %v187_v33 }
 0x238   :  { %v219_v35 = vpop.permute.xlu1 %218 }
 0x239   :  { %237 = vst.msk [vmem:[#allocation2 + $0x56] sm:$0x1] %vm31_vm0, %v219_v35 }
 0x240   :  { %v314_v37 = vpop.permute.xlu1 %313  ;;  %v537_v38 = vld [vmem:[#allocation2 + $0x50] sm:$0xff] }
 0x241   :  { %332 = vst.msk [vmem:[#allocation2 + $0x59] sm:$0x1] %vm31_vm0, %v314_v37  ;;  %703 = vxpose.xlu0.b32.start [1/2] (short) (narrow) %v537_v38, 16 }
 0x248   :  { %v378_v39 = vpop.permute.xlu1 %377 }
 0x249   :  { %396 = vst.msk [vmem:[#allocation2 + $0x5b] sm:$0x1] %vm31_vm0, %v378_v39 }
 0x250   :  { %v442_v40 = vpop.permute.xlu1 %441 }
 0x251   :  { %460 = vst.msk [vmem:[#allocation2 + $0x5d] sm:$0x1] %vm31_vm0, %v442_v40 }
 0x258   :  { %v506_v4 = vpop.permute.xlu1 %505 }
 0x259   :  { %524 = vst.msk [vmem:[#allocation2 + $0x5f] sm:$0x1] %vm31_vm0, %v506_v4 }
 0x260   :  { %v538_v41 = vld [vmem:[#allocation2 + $0x58] sm:$0xff] }
 0x261   :  { %704 = vxpose.xlu0.b32.end [2/2] (short) (narrow) %v538_v41, 16  ;;  %381 = vrot.lane.b32.xlu2 %v2338_v49, %s2053_s2  ;;  %v882_v49 = vpop.f32.mrf.mxu0 }
 0x269   :  { %915 = vxpose.xlu0.b32.start [1/2] (short) (narrow) %v867_v42, 32 }
 0x271   :  { %916 = vxpose.xlu0.b32.end [2/2] (short) (narrow) %v870_v43, 32 }
 0x287   :  { %767 = vxpose.xlu2.b32.start [1/2] (short) (narrow) %v541_v45, 16 }
 0x289   :  { %947 = vxpose.xlu0.b32.start [1/2] (short) (narrow) %v873_v44, 32  ;;  %v655_v46 = vpop.trf.xlu2 }
 0x28a   :  { %1995 = vmatmul.msk.f32.gmra.mxu0 %vm801_vm1, %v655_v46 }
 0x291   :  { %948 = vxpose.xlu0.b32.end [2/2] (short) (narrow) %v876_v47, 32  ;;  %v656_v48 = vpop.trf.xlu2 }
 0x292   :  { %1996 = vmatmul.msk.f32.gmra.mxu0 %vm801_vm1, %v656_v48 }
 0x29c   :  { %v751_v51 = vpop.trf.xlu0 }
 0x29d   :  { %2001 = vmatmul.msk.f32.vlgmr.msra.gmra.mxu3 %vm801_vm1, %v751_v51 }
 0x2a4   :  { %v752_v13 = vpop.trf.xlu0 }
 0x2a5   :  { %2002 = vmatmul.msk.f32.gmra.mxu3 %vm801_vm1, %v752_v13 }
 0x2a9   :  { %979 = vxpose.xlu0.b32.start [1/2] (short) (narrow) %v879_v50, 32 }
 0x2b1   :  { %980 = vxpose.xlu0.b32.end [2/2] (short) (narrow) %v882_v49, 32 }
 0x2bb   :  { %v382_v14 = vpop.permute.xlu2 %381 }
 0x2bc   :  { %398 = vst.msk [vmem:[#allocation2 + $0x7b] sm:$0x1] %vm31_vm0, %v382_v14 }
 0x2bf   :  { %v687_v52 = vpop.trf.xlu1 }
 0x2c0   :  { %1997 = vmatmul.msk.f32.gmra.mxu0 %vm801_vm1, %v687_v52 }
 0x2c3   :  { %v542_v15 = vld [vmem:[#allocation2 + $0x78] sm:$0xff] }
 0x2c4   :  { %768 = vxpose.xlu2.b32.end [2/2] (short) (narrow) %v542_v15, 16 }
 0x2c7   :  { %v688_v53 = vpop.trf.xlu1 }
 0x2c8   :  { %1998 = vmatmul.msk.f32.gmra.mxu0 %vm801_vm1, %v688_v53 }
 0x2fd   :  { %v719_v54 = vpop.trf.xlu0 }
 0x2fe   :  { %1999 = vmatmul.msk.f32.gmra.mxu0 %vm801_vm1, %v719_v54 }
 0x305   :  { %v720_v55 = vpop.trf.xlu0 }
 0x306   :  { %2000 = vmatmul.msk.f32.gmra.mxu0 %vm801_vm1, %v720_v55 }
 0x307   :  { %v885_v56 = vpop.f32.mrf.mxu0 }
 0x308   :  { %1011 = vxpose.xlu2.b32.start [1/2] (short) (narrow) %v885_v56, 32 }
 0x30d   :  { %v931_v5 = vpop.trf.xlu0 }
 0x30e   :  { %2005 = vmatmul.msk.f32.vlgmr.msra.gmra.mxu1 %vm801_vm1, %v931_v5 }
 0x30f   :  { %v888_v57 = vpop.f32.mrf.mxu0 }
 0x310   :  { %1012 = vxpose.xlu2.b32.end [2/2] (short) (narrow) %v888_v57, 32 }
 0x315   :  { %v932_v7 = vpop.trf.xlu0 }
 0x316   :  { %2006 = vmatmul.msk.f32.gmra.mxu1 %vm801_vm1, %v932_v7 }
 0x31d   :  { %v933_v12 = vpop.trf.xlu0 }
 0x31e   :  { %2007 = vmatmul.msk.f32.gmra.mxu1 %vm801_vm1, %v933_v12 }
 0x320   :  { %v903_v62 = vpop.f32.mrf.mxu3 }
 0x325   :  { %v934_v10 = vpop.trf.xlu0 }
 0x326   :  { %2008 = vmatmul.msk.f32.gmra.mxu1 %vm801_vm1, %v934_v10 }
 0x328   :  { %1107 = vxpose.xlu2.b32.start [1/2] (short) (narrow) %v903_v62, 32  ;;  %v906_v16 = vpop.f32.mrf.mxu3 }
 0x32d   :  { %v963_v18 = vpop.trf.xlu0 }
 0x32e   :  { %2009 = vmatmul.msk.f32.gmra.mxu1 %vm801_vm1, %v963_v18 }
 0x330   :  { %1108 = vxpose.xlu2.b32.end [2/2] (short) (narrow) %v906_v16, 32 }
 0x335   :  { %v964_v20 = vpop.trf.xlu0 }
 0x336   :  { %2010 = vmatmul.msk.f32.gmra.mxu1 %vm801_vm1, %v964_v20 }
 0x33d   :  { %v891_v58 = vpop.f32.mrf.mxu0  ;;  %v965_v22 = vpop.trf.xlu0 }
 0x33e   :  { %1043 = vxpose.xlu1.b32.start [1/2] (short) (narrow) %v891_v58, 32  ;;  %2011 = vmatmul.msk.f32.gmra.mxu1 %vm801_vm1, %v965_v22 }
 0x345   :  { %v894_v59 = vpop.f32.mrf.mxu0  ;;  %v966_v24 = vpop.trf.xlu0 }
 0x346   :  { %1044 = vxpose.xlu1.b32.end [2/2] (short) (narrow) %v894_v59, 32  ;;  %2012 = vmatmul.msk.f32.gmra.mxu1 %vm801_vm1, %v966_v24 }
 0x34d   :  { %v995_v27 = vpop.trf.xlu0 }
 0x34e   :  { %2013 = vmatmul.msk.f32.gmra.mxu1 %vm801_vm1, %v995_v27 }
 0x355   :  { %v783_v60 = vpop.trf.xlu2  ;;  %v996_v29 = vpop.trf.xlu0 }
 0x356   :  { %2003 = vmatmul.msk.f32.gmra.mxu3 %vm801_vm1, %v783_v60  ;;  %2014 = vmatmul.msk.f32.gmra.mxu1 %vm801_vm1, %v996_v29 }
 0x35d   :  { %v784_v61 = vpop.trf.xlu2  ;;  %v997_v31 = vpop.trf.xlu0 }
 0x35e   :  { %2004 = vmatmul.msk.f32.gmra.mxu3 %vm801_vm1, %v784_v61  ;;  %2015 = vmatmul.msk.f32.gmra.mxu1 %vm801_vm1, %v997_v31 }
 0x365   :  { %v998_v33 = vpop.trf.xlu0 }
 0x366   :  { %2016 = vmatmul.msk.f32.gmra.mxu1 %vm801_vm1, %v998_v33 }
 0x37b   :  { %v897_v63 = vpop.f32.mrf.mxu0 }
 0x37c   :  { %1075 = vxpose.xlu1.b32.start [1/2] (short) (narrow) %v897_v63, 32 }
 0x383   :  { %v900_v0 = vpop.f32.mrf.mxu0 }
 0x384   :  { %1076 = vxpose.xlu1.b32.end [2/2] (short) (narrow) %v900_v0, 32 }
 0x38b   :  { %v2472_v38 = vpop.f32.mrf.mxu1 }
 0x38c   :  { %v1414_v57 = vrot.slane %v2472_v38, 1  ;;  %v1523_v60 = vrot.slane %v2472_v38, 7  ;;  %v1452_v16 = vrot.slane %v2472_v38, 3 }
 0x393   :  { %v2476_v40 = vpop.f32.mrf.mxu1 }
 0x394   :  { %v1635_v63 = vrot.slane %v2476_v40, 5  ;;  %v1583_v62 = vrot.slane %v2476_v40, 2 }
 0x39b   :  { %v2480_v42 = vpop.f32.mrf.mxu1 }
 0x39c   :  { %v1749_v5 = vrot.slane %v2480_v42, 3 }
 0x3a1   :  { %v1027_v3 = vpop.trf.xlu2 }
 0x3a2   :  { %2017 = vmatmul.msk.f32.vlgmr.msra.gmra.mxu2 %vm801_vm1, %v1027_v3  ;;  %v1713_v3 = vrot.slane %v2480_v42, 1 }
 0x3a3   :  { %v2486_v45 = vpop.f32.mrf.mxu1 }
 0x3a4   :  { %v1967_v22 = vrot.slane %v2486_v45, 7 }
 0x3a9   :  { %v1028_v6 = vpop.trf.xlu2 }
 0x3aa   :  { %2018 = vmatmul.msk.f32.gmra.mxu2 %vm801_vm1, %v1028_v6 }
 0x3ab   :  { %v2491_v48 = vpop.f32.mrf.mxu1 }
 0x3ac   :  { %v1524_v29 = vrot.slane %v2491_v48, 6  ;;  %v1488_v33 = vrot.slane %v2491_v48, 4  ;;  %v1415_v12 = vsel %vm1391_vm2, %v2491_v48, %v1414_v57  ;;  %v1434_v59 = vrot.slane %v2491_v48, 1 }
 0x3b1   :  { %v1029_v8 = vpop.trf.xlu2 }
 0x3b2   :  { %2019 = vmatmul.msk.f32.gmra.mxu2 %vm801_vm1, %v1029_v8 }
 0x3b3   :  { %v2496_v49 = vpop.f32.mrf.mxu1 }
 0x3b9   :  { %v1030_v11 = vpop.trf.xlu2 }
 0x3ba   :  { %2020 = vmatmul.msk.f32.gmra.mxu2 %vm801_vm1, %v1030_v11 }
 0x3bb   :  { %v2500_v14 = vpop.f32.mrf.mxu1 }
 0x3c1   :  { %v1123_v26 = vpop.trf.xlu2 }
 0x3c2   :  { %2029 = vmatmul.msk.f32.vlgmr.msrb.gmra.mxu3 %vm801_vm1, %v1123_v26 }
 0x3c3   :  { %v2504_v15 = vpop.f32.mrf.mxu1 }
 0x3c4   :  { %v1845_v24 = vrot.slane %v2504_v15, 7 }
 0x3c6   :  { %v2591_v0 = vsel %vm1391_vm2, %v1845_v24, %v2486_v45  ;;  %v1565_v24 = vrot.slane %v2476_v40, 1 }
 0x3c9   :  { %v1124_v28 = vpop.trf.xlu2 }
 0x3ca   :  { %2030 = vmatmul.msk.f32.gmra.mxu3 %vm801_vm1, %v1124_v28  ;;  %v1433_v28 = vrot.slane %v2472_v38, 2 }
 0x3cb   :  { %v2508_v54 = vpop.f32.mrf.mxu1 }
 0x3cc   :  { %v1490_v18 = vrot.slane %v2508_v54, 3 }
 0x3d1   :  { %v1125_v30 = vpop.trf.xlu2 }
 0x3d2   :  { %2031 = vmatmul.msk.f32.gmra.mxu3 %vm801_vm1, %v1125_v30 }
 0x3d3   :  { %v2532_v10 = vpop.f32.mrf.mxu1 }
 0x3d9   :  { %v909_v9 = vpop.f32.mrf.mxu3  ;;  %v1126_v32 = vpop.trf.xlu2 }
 0x3da   :  { %1139 = vxpose.xlu2.b32.start [1/2] (short) (narrow) %v909_v9, 32  ;;  %2032 = vmatmul.msk.f32.gmra.mxu3 %vm801_vm1, %v1126_v32  ;;  %v1487_v32 = vrot.slane %v2472_v38, 5  ;;  %v1916_v9 = vrot.slane %v2504_v15, 3 }
 0x3dc   :  { %v1489_v8 = vsel %vm1391_vm2, %v1488_v33, %v1487_v32  ;;  %v1968_v33 = vrot.slane %v2504_v15, 6 }
 0x3dd   :  { %v1491_v57 = vsel %vm1394_vm3, %v1490_v18, %v1489_v8  ;;  %v1435_v18 = vsel %vm1391_vm2, %v1434_v59, %v1433_v28 }
 0x3de   :  { %v1436_v59 = vsel %vm1394_vm3, %v2508_v54, %v1435_v18 }
 0x3e1   :  { %v912_v17 = vpop.f32.mrf.mxu3 }
 0x3e2   :  { %1140 = vxpose.xlu2.b32.end [2/2] (short) (narrow) %v912_v17, 32  ;;  %v1059_v19 = vpop.trf.xlu1  ;;  %v1879_v17 = vrot.slane %v2486_v45, 2 }
 0x3e3   :  { %2021 = vmatmul.msk.f32.gmra.mxu2 %vm801_vm1, %v1059_v19  ;;  %v1915_v19 = vrot.slane %v2486_v45, 4 }
 0x3ea   :  { %v1060_v21 = vpop.trf.xlu1 }
 0x3eb   :  { %2022 = vmatmul.msk.f32.gmra.mxu2 %vm801_vm1, %v1060_v21  ;;  %v1880_v21 = vrot.slane %v2504_v15, 1 }
 0x3f2   :  { %v1061_v23 = vpop.trf.xlu1 }
 0x3f3   :  { %2023 = vmatmul.msk.f32.gmra.mxu2 %vm801_vm1, %v1061_v23  ;;  %v1416_v23 = vrot.slane %v2508_v54, 7 }
 0x3f5   :  { %v1417_v30 = vsel %vm1394_vm3, %v1416_v23, %v1415_v12  ;;  %v1638_v23 = vrot.slane %v2532_v10, 3 }
 0x3fa   :  { %v1062_v25 = vpop.trf.xlu1 }
 0x3fb   :  { %2024 = vmatmul.msk.f32.gmra.mxu2 %vm801_vm1, %v1062_v25 }
 0x420   :  { %v1091_v34 = vpop.trf.xlu1 }
 0x421   :  { %2025 = vmatmul.msk.f32.gmra.mxu2 %vm801_vm1, %v1091_v34  ;;  %v1453_v34 = vrot.slane %v2491_v48, 2 }
 0x425   :  { %v2474_v39 = vpop.f32.mrf.mxu2 }
 0x426   :  { %v1492_v32 = vrot.slane %v2474_v39, 2  ;;  %v1418_v1 = vrot.slane %v2474_v39, 6 }
 0x428   :  { %v1092_v35 = vpop.trf.xlu1  ;;  %v1493_v31 = vsel %vm1397_vm4, %v1492_v32, %v1491_v57  ;;  %v1419_v12 = vsel %vm1397_vm4, %v1418_v1, %v1417_v30 }
 0x429   :  { %2026 = vmatmul.msk.f32.gmra.mxu2 %vm801_vm1, %v1092_v35  ;;  %v1636_v35 = vrot.slane %v2496_v49, 4 }
 0x42b   :  { %v1637_v1 = vsel %vm1391_vm2, %v1636_v35, %v1635_v63  ;;  %v1881_v35 = vsel %vm1391_vm2, %v1880_v21, %v1879_v17 }
 0x42c   :  { %v1639_v63 = vsel %vm1394_vm3, %v1638_v23, %v1637_v1 }
 0x42d   :  { %v2478_v4 = vpop.f32.mrf.mxu2 }
 0x430   :  { %v1093_v36 = vpop.trf.xlu1 }
 0x431   :  { %2027 = vmatmul.msk.f32.gmra.mxu2 %vm801_vm1, %v1093_v36  ;;  %v1567_v36 = vrot.slane %v2532_v10, 7 }
 0x435   :  { %v2483_v43 = vpop.f32.mrf.mxu2 }
 0x438   :  { %v1094_v37 = vpop.trf.xlu1 }
 0x439   :  { %2028 = vmatmul.msk.f32.gmra.mxu2 %vm801_vm1, %v1094_v37  ;;  %v2576_v37 = vpop.f32.mrf.mxu1 }
 0x43d   :  { %v2488_v46 = vpop.f32.mrf.mxu2 }
 0x441   :  { %v2628_v11 = vpop.f32.mrf.mxu1 }
 0x442   :  { %v1882_v26 = vsel %vm1394_vm3, %v2628_v11, %v1881_v35  ;;  %v1970_v32 = vrot.slane %v2628_v11, 5 }
 0x445   :  { %v2512_v56 = vpop.f32.mrf.mxu3 }
 0x446   :  { %3404 = vst [vmem:[#allocation6_spill] sm:$0xff] %v2512_v56 }
 0x44d   :  { %v2544_v25 = vpop.f32.mrf.mxu3 }
 0x455   :  { %v2587_v6 = vpop.f32.mrf.mxu3 }
 0x45d   :  { %v2644_v1 = vpop.f32.mrf.mxu3 }
 0x45e   :  { %v1889_v35 = vrot.slane %v2644_v1, 4 }
 0x466   :  { %v2493_v50 = vpop.f32.mrf.mxu2 }
 0x467   :  { %3401 = vst [vmem:[#allocation3_spill] sm:$0xff] %v2493_v50  ;;  %v1494_v8 = vrot.slane %v2493_v50, 1  ;;  %v1420_v61 = vrot.slane %v2493_v50, 5  ;;  %v1439_v57 = vrot.slane %v2493_v50, 6 }
 0x469   :  { %v2611_v28 = vsel %vm1400_vm5, %v1494_v8, %v1493_v31  ;;  %v2619_v30 = vsel %vm1400_vm5, %v1420_v61, %v1419_v12  ;;  %v1566_v61 = vsel %vm1391_vm2, %v2496_v49, %v1565_v24  ;;  %v1883_v12 = vrot.slane %v2488_v46, 7 }
 0x46a   :  { %v1569_v24 = vrot.slane %v2478_v4, 6  ;;  %v1568_v27 = vsel %vm1394_vm3, %v1567_v36, %v1566_v61  ;;  %v1528_v61 = vrot.slane %v2474_v39, 4 }
 0x46b   :  { %v1884_v17 = vsel %vm1397_vm4, %v1883_v12, %v1882_v26  ;;  %v1525_v26 = vsel %vm1391_vm2, %v1524_v29, %v1523_v60  ;;  %v1526_v12 = vrot.slane %v2508_v54, 5  ;;  %v1752_v29 = vrot.slane %v2576_v37, 1 }
 0x46e   :  { %v2498_v13 = vpop.f32.mrf.mxu2 }
 0x46f   :  { %v1571_v58 = vrot.slane %v2498_v13, 5 }
 0x473   :  { %v1155_v41 = vpop.trf.xlu2 }
 0x474   :  { %2033 = vmatmul.msk.f32.gmra.mxu3 %vm801_vm1, %v1155_v41  ;;  %v2595_v41 = vsel %vm1391_vm2, %v1916_v9, %v1915_v19  ;;  %v1437_v9 = vrot.slane %v2474_v39, 7 }
 0x476   :  { %v2502_v52 = vpop.f32.mrf.mxu2  ;;  %v1438_v8 = vsel %vm1397_vm4, %v1437_v9, %v1436_v59  ;;  %v1640_v9 = vrot.slane %v2478_v4, 2  ;;  %v1642_v59 = vrot.slane %v2498_v13, 1 }
 0x477   :  { %3402 = vst [vmem:[#allocation4_spill] sm:$0xff] %v2502_v52 }
 0x47b   :  { %v1156_v44 = vpop.trf.xlu2 }
 0x47c   :  { %2034 = vmatmul.msk.f32.gmra.mxu3 %vm801_vm1, %v1156_v44  ;;  %v1750_v44 = vrot.slane %v2500_v14, 2 }
 0x47e   :  { %v2506_v53 = vpop.f32.mrf.mxu2  ;;  %v1751_v60 = vsel %vm1391_vm2, %v1750_v44, %v1749_v5  ;;  %v1969_v5 = vsel %vm1391_vm2, %v1968_v33, %v1967_v22  ;;  %v1972_v44 = vrot.slane %v2488_v46, 4 }
 0x47f   :  { %v1885_v23 = vrot.slane %v2506_v53, 6 }
 0x481   :  { %v1886_v18 = vsel %vm1400_vm5, %v1885_v23, %v1884_v17  ;;  %v1530_v23 = vrot.slane %v2493_v50, 3 }
 0x483   :  { %v1157_v47 = vpop.trf.xlu2 }
 0x484   :  { %2035 = vmatmul.msk.f32.gmra.mxu3 %vm801_vm1, %v1157_v47  ;;  %v1584_v47 = vrot.slane %v2496_v49, 1 }
 0x486   :  { %v1585_v7 = vsel %vm1391_vm2, %v1584_v47, %v1583_v62  ;;  %v1753_v47 = vsel %vm1394_vm3, %v1752_v29, %v1751_v60 }
 0x487   :  { %v1586_v60 = vsel %vm1394_vm3, %v2532_v10, %v1585_v7  ;;  %v1570_v7 = vsel %vm1397_vm4, %v1569_v24, %v1568_v27  ;;  %v1847_v27 = vrot.slane %v2628_v11, 6  ;;  %v3410_v24 = vrot.slane %v2480_v42, 5 }
 0x48b   :  { %v1158_v51 = vpop.trf.xlu2 }
 0x48c   :  { %2036 = vmatmul.msk.f32.gmra.mxu3 %vm801_vm1, %v1158_v51 }
 0x4a4   :  { %v2510_v55 = vpop.f32.mrf.mxu2 }
 0x4a5   :  { %3403 = vst [vmem:[#allocation5_spill] sm:$0xff] %v2510_v55  ;;  %v1532_v17 = vrot.slane %v2510_v55, 2 }
 0x4ac   :  { %v2538_v20 = vpop.f32.mrf.mxu2 }
 0x4b4   :  { %v2581_v2 = vpop.f32.mrf.mxu2 }
 0x4b5   :  { %v1757_v19 = vrot.slane %v2581_v2, 6 }
 0x4bc   :  { %v2637_v31 = vpop.f32.mrf.mxu2 }
 0x4bd   :  { %v1887_v21 = vrot.slane %v2637_v31, 5 }
 0x4bf   :  { %v1888_v51 = vsel %vm1403_vm6, %v1887_v21, %v1886_v18  ;;  %v1527_v18 = vsel %vm1394_vm3, %v1526_v12, %v1525_v26  ;;  %v1754_v12 = vsel %vm1397_vm4, %v2483_v43, %v1753_v47  ;;  %v1732_v47 = vrot.slane %v2500_v14, 1 }
 0x4c0   :  { %v2663_v36 = vsel %vm1406_vm7, %v1889_v35, %v1888_v51  ;;  %v1587_v51 = vrot.slane %v2478_v4, 7  ;;  %v1529_v21 = vsel %vm1397_vm4, %v1528_v61, %v1527_v18  ;;  %v1755_v35 = vrot.slane %v2502_v52, 7 }
 0x4c1   :  { %3405 = vst [vmem:[#allocation7_spill] sm:$0xff] %v2663_v36  ;;  %v1531_v62 = vsel %vm1400_vm5, %v1530_v23, %v1529_v21  ;;  %v1971_v61 = vsel %vm1394_vm3, %v1970_v32, %v1969_v5  ;;  %v1974_v23 = vrot.slane %v2506_v53, 3  ;;  %v1641_v18 = vsel %vm1397_vm4, %v1640_v9, %v1639_v63 }
 0x4c2   :  { %v2689_v26 = vsel %vm1403_vm6, %v1532_v17, %v1531_v62  ;;  %v1756_v29 = vsel %vm1400_vm5, %v1755_v35, %v1754_v12  ;;  %v1973_v22 = vsel %vm1397_vm4, %v1972_v44, %v1971_v61  ;;  %v1976_v21 = vrot.slane %v2637_v31, 2 }
 0x4c3   :  { %v2701_v33 = vsel %vm1403_vm6, %v1757_v19, %v1756_v29  ;;  %v1975_v17 = vsel %vm1400_vm5, %v1974_v23, %v1973_v22  ;;  %v1978_v32 = vrot.slane %v2644_v1, 1  ;;  %v1440_v63 = vsel %vm1400_vm5, %v1439_v57, %v1438_v8 }
 0x4c4   :  { %v1589_v9 = vrot.slane %v2498_v13, 6  ;;  %v1588_v35 = vsel %vm1397_vm4, %v1587_v51, %v1586_v60  ;;  %v1731_v19 = vrot.slane %v2480_v42, 2  ;;  %v1977_v5 = vsel %vm1403_vm6, %v1976_v21, %v1975_v17 }
 0x4c5   :  { %v1643_v44 = vsel %vm1400_vm5, %v1642_v59, %v1641_v18  ;;  %v1645_v12 = vrot.slane %v2544_v25, 7  ;;  %v2720_v57 = vsel %vm1406_vm7, %v1978_v32, %v1977_v5  ;;  %v1572_v8 = vsel %vm1400_vm5, %v1571_v58, %v1570_v7 }
 0x4c6   :  { %3406 = vst [vmem:[#allocation8_spill] sm:$0xff] %v2720_v57  ;;  %v1454_v51 = vsel %vm1391_vm2, %v1453_v34, %v1452_v16  ;;  %v1918_v59 = vrot.slane %v2628_v11, 2  ;;  %v2732_v23 = vsel %vm1400_vm5, %v1589_v9, %v1588_v35  ;;  %v1455_v18 = vrot.slane %v2508_v54, 1 }
 0x4c7   :  { %v1458_v60 = vrot.slane %v2493_v50, 7  ;;  %v1733_v58 = vsel %vm1391_vm2, %v1732_v47, %v1731_v19  ;;  %v1801_v22 = vrot.slane %v2480_v42, 6  ;;  %v1802_v17 = vrot.slane %v2500_v14, 5 }
 0x4c8   :  { %v1952_v16 = vrot.slane %v2628_v11, 4  ;;  %v1496_v34 = vsel %vm1403_vm6, %v2510_v55, %v2611_v28  ;;  %v1422_v32 = vrot.slane %v2510_v55, 4  ;;  %v2748_v7 = vsel %vm1394_vm3, %v1847_v27, %v2591_v0 }
 0x4c9   :  { %3407 = vst [vmem:[#allocation9_spill] sm:$0xff] %v2748_v7  ;;  %v1441_v9 = vrot.slane %v2510_v55, 5  ;;  %v1735_v35 = vrot.slane %v2483_v43, 7  ;;  %v1715_v19 = vrot.slane %v2576_v37, 7  ;;  %v2755_v47 = vsel %vm1394_vm3, %v1918_v59, %v2595_v41 }
 0x4ca   :  { %3408 = vst [vmem:[#allocation10_spill] sm:$0xff] %v2755_v47  ;;  %v1734_v5 = vsel %vm1394_vm3, %v2576_v37, %v1733_v58  ;;  %v1714_v28 = vsel %vm1391_vm2, %v2500_v14, %v1713_v3  ;;  %v1804_v0 = vrot.slane %v2576_v37, 4  ;;  %v3409_v27 = vrot.slane %v2512_v56, 7 }
 0x4cb   :  { %v1737_v62 = vrot.slane %v2502_v52, 6  ;;  %v1803_v41 = vsel %vm1391_vm2, %v1802_v17, %v1801_v22  ;;  %v1786_v59 = vrot.slane %v2576_v37, 3  ;;  %v1423_v58 = vsel %vm1403_vm6, %v1422_v32, %v2619_v30 }
 0x4cc   :  { %v2767_v21 = vsel %vm1406_vm7, %v3409_v27, %v1496_v34  ;;  %v1741_v29 = vrot.slane %v2587_v6, 4  ;;  %v1717_v3 = vrot.slane %v2483_v43, 6  ;;  %v3411_v61 = vrot.slane %v2500_v14, 4 }
 0x4cd   :  { %v1442_v27 = vsel %vm1403_vm6, %v1441_v9, %v1440_v63  ;;  %v1736_v36 = vsel %vm1397_vm4, %v1735_v35, %v1734_v5  ;;  %v1716_v22 = vsel %vm1394_vm3, %v1715_v19, %v1714_v28  ;;  %v1806_v17 = vrot.slane %v2483_v43, 3 }
 0x4ce   :  { %v1785_v34 = vsel %vm1391_vm2, %v3411_v61, %v3410_v24  ;;  %v1805_v30 = vsel %vm1394_vm3, %v1804_v0, %v1803_v41  ;;  %v1788_v32 = vrot.slane %v2483_v43, 2  ;;  %v1949_v57 = vrot.slane %v2486_v45, 6 }
 0x4cf   :  { %v1950_v47 = vrot.slane %v2504_v15, 5  ;;  %v3412_v7 = vrot.slane %v2512_v56, 3  ;;  %v1573_v63 = vrot.slane %v2538_v20, 4  ;;  %v1719_v24 = vrot.slane %v2502_v52, 5 }
 0x4d0   :  { %v1787_v9 = vsel %vm1394_vm3, %v1786_v59, %v1785_v34  ;;  %v1644_v35 = vsel %vm1403_vm6, %v2538_v20, %v1643_v44  ;;  %v1718_v19 = vsel %vm1397_vm4, %v1717_v3, %v1716_v22  ;;  %v1808_v5 = vrot.slane %v2502_v52, 2 }
 0x4d1   :  { %v2792_v61 = vsel %vm1406_vm7, %v3412_v7, %v1423_v58  ;;  %v1456_v28 = vsel %vm1394_vm3, %v1455_v18, %v1454_v51  ;;  %v3413_v0 = vrot.slane %v2512_v56, 4  ;;  %v1738_v41 = vsel %vm1400_vm5, %v1737_v62, %v1736_v36 }
 0x4d2   :  { %v1807_v58 = vsel %vm1397_vm4, %v1806_v17, %v1805_v30  ;;  %v1790_v59 = vrot.slane %v2502_v52, 1  ;;  %v1591_v34 = vrot.slane %v2538_v20, 5  ;;  %v1723_v44 = vrot.slane %v2587_v6, 3 }
 0x4d3   :  { %v2805_v7 = vsel %vm1406_vm7, %v3413_v0, %v1442_v27  ;;  %v1789_v3 = vsel %vm1397_vm4, %v1788_v32, %v1787_v9  ;;  %v1951_v22 = vsel %vm1391_vm2, %v1950_v47, %v1949_v57  ;;  %v2815_v51 = vsel %vm1406_vm7, %v1645_v12, %v1644_v35 }
 0x4d4   :  { %v1574_v18 = vsel %vm1403_vm6, %v1573_v63, %v1572_v8  ;;  %v1720_v27 = vsel %vm1400_vm5, %v1719_v24, %v1718_v19  ;;  %v1457_v36 = vsel %vm1397_vm4, %v2474_v39, %v1456_v28  ;;  %v1739_v62 = vrot.slane %v2581_v2, 5 }
 0x4d5   :  { %v1721_v17 = vrot.slane %v2581_v2, 4  ;;  %v1809_v30 = vsel %vm1400_vm5, %v1808_v5, %v1807_v58  ;;  %v1810_v32 = vrot.slane %v2581_v2, 1  ;;  %v1791_v57 = vsel %vm1400_vm5, %v1790_v59, %v1789_v3 }
 0x4d6   :  { %v1953_v12 = vsel %vm1394_vm3, %v1952_v16, %v1951_v22  ;;  %v1954_v47 = vrot.slane %v2488_v46, 3  ;;  %v1460_v8 = vrot.slane %v2510_v55, 6  ;;  %v1459_v63 = vsel %vm1400_vm5, %v1458_v60, %v1457_v36 }
 0x4d7   :  { %v1601_v24 = vrot.slane %v2476_v40, 3  ;;  %v1602_v9 = vrot.slane %v2496_v49, 2  ;;  %v3414_v35 = vrot.slane %v2472_v38, 4  ;;  %v3415_v19 = vrot.slane %v2491_v48, 3 }
 0x4d8   :  { %v1592_v28 = vsel %vm1403_vm6, %v1591_v34, %v2732_v23  ;;  %v1793_v16 = vrot.slane %v2587_v6, 7  ;;  %v1956_v0 = vrot.slane %v2506_v53, 2  ;;  %v1462_v58 = vrot.slane %v2512_v56, 5 }
 0x4d9   :  { %v1473_v5 = vsel %vm1391_vm2, %v3415_v19, %v3414_v35  ;;  %v1740_v60 = vsel %vm1403_vm6, %v1739_v62, %v1738_v41  ;;  %v1722_v59 = vsel %vm1403_vm6, %v1721_v17, %v1720_v27  ;;  %v1811_v3 = vsel %vm1403_vm6, %v1810_v32, %v1809_v30 }
 0x4da   :  { %v1792_v22 = vsel %vm1403_vm6, %v2581_v2, %v1791_v57  ;;  %v1955_v36 = vsel %vm1397_vm4, %v1954_v47, %v1953_v12  ;;  %v1461_v35 = vsel %vm1403_vm6, %v1460_v8, %v1459_v63  ;;  %v1604_v23 = vrot.slane %v2532_v10, 1 }
 0x4db   :  { %v3416_v34 = vrot.slane %v2508_v54, 2  ;;  %v3417_v52 = vrot.slane %v2544_v25, 3  ;;  %v3418_v27 = vrot.slane %v2544_v25, 4  ;;  %v1603_v17 = vsel %vm1391_vm2, %v1602_v9, %v1601_v24 }
 0x4dc   :  { %v3419_v30 = vrot.slane %v2491_v48, 7  ;;  %v2869_v57 = vsel %vm1406_vm7, %v1741_v29, %v1740_v60  ;;  %v2872_v12 = vsel %vm1406_vm7, %v1723_v44, %v1722_v59  ;;  %v2882_v47 = vsel %vm1400_vm5, %v1956_v0, %v1955_v36 }
 0x4dd   :  { %v1475_v19 = vsel %vm1394_vm3, %v3416_v34, %v1473_v5  ;;  %v2856_v41 = vsel %vm1406_vm7, %v3417_v52, %v1574_v18  ;;  %v2861_v62 = vsel %vm1406_vm7, %v3418_v27, %v1592_v28  ;;  %v2876_v52 = vsel %vm1406_vm7, %v2587_v6, %v1811_v3 }
 0x4de   :  { %v1392_v32 = vsel %vm1391_vm2, %v3419_v30, %v2472_v38  ;;  %v2879_v18 = vsel %vm1406_vm7, %v1793_v16, %v1792_v22  ;;  %v2885_v8 = vsel %vm1406_vm7, %v1462_v58, %v1461_v35  ;;  %v3420_v63 = vrot.slane %v2486_v45, 1 }
 0x4df   :  { %v3421_v44 = vrot.slane %v2474_v39, 1  ;;  %v1605_v9 = vsel %vm1394_vm3, %v1604_v23, %v1603_v17  ;;  %v1607_v5 = vrot.slane %v2498_v13, 7  ;;  %v1534_v28 = vrot.slane %v2512_v56, 1 }
 0x4e0   :  { %v1862_v29 = vsel %vm1391_vm2, %v2504_v15, %v3420_v63  ;;  %v3422_v16 = vrot.slane %v2508_v54, 6  ;;  %v1865_v59 = vrot.slane %v2488_v46, 6  ;;  %v1479_v3 = vrot.slane %v2510_v55, 7 }
 0x4e1   :  { %v1477_v24 = vsel %vm1397_vm4, %v3421_v44, %v1475_v19  ;;  %v3423_v22 = vrot.slane %v2628_v11, 7  ;;  %v1867_v35 = vrot.slane %v2506_v53, 5  ;;  %v1606_v19 = vsel %vm1397_vm4, %v2478_v4, %v1605_v9 }
 0x4e2   :  { %v1395_v0 = vsel %vm1394_vm3, %v3422_v16, %v1392_v32  ;;  %v1478_v23 = vsel %vm1400_vm5, %v2493_v50, %v1477_v24  ;;  %v3424_v17 = vrot.slane %v2474_v39, 5  ;;  %v3425_v32 = vrot.slane %v2496_v49, 7 }
 0x4e3   :  { %v1864_v36 = vsel %vm1394_vm3, %v3423_v22, %v1862_v29  ;;  %v1535_v24 = vsel %vm1406_vm7, %v1534_v28, %v2689_v26  ;;  %v3426_v9 = vrot.slane %v2476_v40, 4  ;;  %v3427_v16 = vrot.slane %v2496_v49, 3 }
 0x4e4   :  { %v1398_v30 = vsel %vm1397_vm4, %v3424_v17, %v1395_v0  ;;  %v1550_v63 = vsel %vm1391_vm2, %v3425_v32, %v2476_v40  ;;  %v1481_v17 = vrot.slane %v2512_v56, 6  ;;  %v1480_v32 = vsel %vm1403_vm6, %v1479_v3, %v1478_v23 }
 0x4e5   :  { %v1621_v22 = vsel %vm1391_vm2, %v3427_v16, %v3426_v9  ;;  %v1402_v27 = vrot.slane %v2510_v55, 3  ;;  %v3429_v28 = vrot.slane %v2493_v50, 4  ;;  %v3430_v16 = vrot.slane %v2532_v10, 6 }
 0x4e6   :  { %v1958_v3 = vrot.slane %v2637_v31, 1  ;;  %v1608_v23 = vsel %vm1400_vm5, %v1607_v5, %v1606_v19  ;;  %v1869_v5 = vrot.slane %v2637_v31, 4  ;;  %v1482_v19 = vsel %vm1406_vm7, %v1481_v17, %v1480_v32 }
 0x4e7   :  { %v1401_v9 = vsel %vm1400_vm5, %v3429_v28, %v1398_v30  ;;  %v3433_v30 = vrot.slane %v2532_v10, 2  ;;  %v1559_v17 = vrot.slane %v2544_v25, 2  ;;  %v1557_v32 = vrot.slane %v2538_v20, 3 }
 0x4e8   :  { %v1404_v28 = vsel %vm1403_vm6, %v1402_v27, %v1401_v9  ;;  %v3436_v9 = vrot.slane %v2500_v14, 7  ;;  %v3438_v55 = vrot.slane %v2480_v42, 4 }
 0x4f7   :  { %v2910_v34 = vpop.f32.mrf.mxu3 }
 0x4f8   :  { %v1499_v29 = vrot.slane %v2910_v34, 6  ;;  %v1426_v44 = vrot.slane %v2910_v34, 2  ;;  %v2933_v0 = vsel %vm1409_vm8, %v2910_v34, %v1535_v24  ;;  %v1552_v24 = vsel %vm1394_vm3, %v3430_v16, %v1550_v63 }
 0x4f9   :  { %3428 = vst [vmem:[#allocation11_spill] sm:$0xff] %v2933_v0  ;;  %v1866_v63 = vsel %vm1397_vm4, %v1865_v59, %v1864_v36  ;;  %v3434_v16 = vrot.slane %v2478_v4, 5  ;;  %v3435_v36 = vrot.slane %v2478_v4, 1  ;;  %v1408_v27 = vrot.slane %v2910_v34, 1 }
 0x4fa   :  { %v1500_v60 = vsel %vm1409_vm8, %v1499_v29, %v2767_v21  ;;  %v1427_v26 = vsel %vm1409_vm8, %v1426_v44, %v2792_v61  ;;  %v3431_v21 = vrot.slane %v2476_v40, 7  ;;  %v3432_v61 = vrot.slane %v2496_v49, 6 }
 0x4fb   :  { %1501 = vrot.lane.b32.xlu2 %v1500_v60, %s2056_s20  ;;  %1428 = vrot.lane.b32.xlu1 %v1427_v26, %s2056_s20  ;;  %v1623_v44 = vsel %vm1394_vm3, %v3433_v30, %v1621_v22  ;;  %v1483_v60 = vrot.slane %v2910_v34, 5  ;;  %v1405_v26 = vrot.slane %v2512_v56, 2  ;;  %v1759_v22 = vrot.slane %v2587_v6, 5 }
 0x4fc   :  { %v2957_v29 = vsel %vm1391_vm2, %v3432_v61, %v3431_v21  ;;  %v1554_v21 = vsel %vm1397_vm4, %v3434_v16, %v1552_v24  ;;  %v1445_v61 = vrot.slane %v2910_v34, 3  ;;  %v1625_v30 = vsel %vm1397_vm4, %v3435_v36, %v1623_v44 }
 0x4fd   :  { %v1484_v59 = vsel %vm1409_vm8, %v1483_v60, %v1482_v19  ;;  %v1698_v24 = vsel %vm1391_vm2, %v3436_v9, %v2480_v42  ;;  %v1407_v19 = vsel %vm1406_vm7, %v1405_v26, %v1404_v28  ;;  %v3437_v16 = vrot.slane %v2498_v13, 4 }
 0x4fe   :  { %1486 = vst.msk [vmem:[%s3395_s3 + $0x8] sm:$0xff] %vm1412_vm9, %v1484_v59  ;;  %v1410_v36 = vsel %vm1409_vm8, %v1408_v27, %v1407_v19  ;;  %v1626_v0 = vsel %vm1400_vm5, %v2498_v13, %v1625_v30  ;;  %v1627_v56 = vrot.slane %v2538_v20, 7  ;;  %v3439_v9 = vrot.slane %v2500_v14, 3 }
 0x4ff   :  { %v2977_v58 = vpop.f32.mrf.mxu3  ;;  %v1556_v59 = vsel %vm1400_vm5, %v3437_v16, %v1554_v21  ;;  %v1446_v26 = vsel %vm1409_vm8, %v1445_v61, %v2805_v7  ;;  %1413 = vst.msk [vmem:[%s3395_s3] sm:$0xff] %vm1412_vm9, %v1410_v36  ;;  %v3440_v30 = vrot.slane %v2576_v37, 6  ;;  %v1923_v19 = vrot.slane %v2637_v31, 7 }
 0x500   :  { %v1647_v44 = vrot.slane %v2977_v58, 6  ;;  %v1577_v60 = vrot.slane %v2977_v58, 2  ;;  %v1769_v50 = vsel %vm1391_vm2, %v3439_v9, %v3438_v55  ;;  %v1853_v55 = vrot.slane %v2637_v31, 3 }
 0x501   :  { %v1700_v27 = vsel %vm1394_vm3, %v3440_v30, %v1698_v24  ;;  %v1868_v7 = vsel %vm1400_vm5, %v1867_v35, %v1866_v63  ;;  %v1674_v61 = vrot.slane %v2532_v10, 5  ;;  %v1629_v24 = vrot.slane %v2544_v25, 6 }
 0x502   :  { %v1648_v28 = vsel %vm1409_vm8, %v1647_v44, %v2815_v51  ;;  %v1578_v21 = vsel %vm1409_vm8, %v1577_v60, %v2856_v41  ;;  %v1558_v51 = vsel %vm1403_vm6, %v1557_v32, %v1556_v59  ;;  %v1959_v41 = vsel %vm1403_vm6, %v1958_v3, %v2882_v47 }
 0x503   :  { %1447 = vrot.lane.b32.xlu2 %v1446_v26, %s2054_s18  ;;  %1649 = vrot.lane.b32.xlu1 %v1648_v28, %s2056_s20  ;;  %v3441_v44 = vrot.slane %v2576_v37, 2  ;;  %v3442_v16 = vrot.slane %v2538_v20, 6  ;;  %v1676_v35 = vrot.slane %v2478_v4, 4  ;;  %v1628_v63 = vsel %vm1403_vm6, %v1627_v56, %v1626_v0 }
 0x504   :  { %1579 = vrot.lane.b32.xlu0 %v1578_v21, %s2056_s20  ;;  %v3443_v32 = vrot.slane %v2483_v43, 5  ;;  %v1595_v3 = vrot.slane %v2977_v58, 3  ;;  %v1870_v59 = vsel %vm1403_vm6, %v1869_v5, %v1868_v7  ;;  %v1760_v9 = vsel %vm1406_vm7, %v1759_v22, %v2701_v33  ;;  %v3445_v22 = vld [vmem:[#allocation4_spill] sm:$0xff] }
 0x505   :  { %v1771_v60 = vsel %vm1394_vm3, %v3441_v44, %v1769_v50  ;;  %v1610_v36 = vsel %vm1403_vm6, %v3442_v16, %v1608_v23  ;;  %v1560_v50 = vsel %vm1406_vm7, %v1559_v17, %v1558_v51  ;;  %v1561_v23 = vrot.slane %v2977_v58, 1 }
 0x506   :  { %v1702_v47 = vsel %vm1397_vm4, %v3443_v32, %v1700_v27  ;;  %v1631_v28 = vrot.slane %v2977_v58, 5  ;;  %v1705_v56 = vrot.slane %v2581_v2, 3  ;;  %v3444_v0 = vrot.slane %v2483_v43, 1 }
 0x507   :  { %v3045_v26 = vpop.f32.mrf.mxu3  ;;  %v1630_v33 = vsel %vm1406_vm7, %v1629_v24, %v1628_v63  ;;  %v3446_v17 = vrot.slane %v3445_v22, 4  ;;  %v1562_v51 = vsel %vm1409_vm8, %v1561_v23, %v1560_v50  ;;  %v1775_v16 = vrot.slane %v2581_v2, 7 }
 0x508   :  { %v1773_v21 = vsel %vm1397_vm4, %v3444_v0, %v1771_v60  ;;  %v1743_v30 = vrot.slane %v3045_v26, 3  ;;  %v1725_v5 = vrot.slane %v3045_v26, 2  ;;  %v1761_v7 = vrot.slane %v3045_v26, 4  ;;  %1564 = vst.msk [vmem:[%s3395_s3 + $0x10] sm:$0xff] %vm1412_vm9, %v1562_v51 }
 0x509   :  { %v1704_v27 = vsel %vm1400_vm5, %v3446_v17, %v1702_v47  ;;  %v1632_v44 = vsel %vm1409_vm8, %v1631_v28, %v1630_v33  ;;  %v1596_v60 = vsel %vm1409_vm8, %v1595_v3, %v2861_v62  ;;  %v1774_v63 = vsel %vm1400_vm5, %v3445_v22, %v1773_v21  ;;  %v3449_v21 = vld [vmem:[#allocation9_spill] sm:$0xff] }
 0x50a   :  { %v1744_v32 = vsel %vm1409_vm8, %v1743_v30, %v2869_v57  ;;  %v1726_v24 = vsel %vm1409_vm8, %v1725_v5, %v2872_v12  ;;  %v1960_v62 = vsel %vm1406_vm7, %v2644_v1, %v1959_v41  ;;  %v3447_v57 = vrot.slane %v2544_v25, 5  ;;  %1634 = vst.msk [vmem:[%s3395_s3 + $0x18] sm:$0xff] %vm1412_vm9, %v1632_v44 }
 0x50b   :  { %1597 = vrot.lane.b32.xlu2 %v1596_v60, %s2054_s18  ;;  %1727 = vrot.lane.b32.xlu1 %v1726_v24, %s2056_s20  ;;  %v3085_v12 = vsel %vm1409_vm8, %v1761_v7, %v1760_v9  ;;  %v3448_v3 = vrot.slane %v2644_v1, 3  ;;  %v1675_v41 = vsel %vm1394_vm3, %v1674_v61, %v2957_v29  ;;  %v1777_v9 = vrot.slane %v2587_v6, 6 }
 0x50c   :  { %v3082_v47 = vsel %vm1406_vm7, %v3447_v57, %v1610_v36  ;;  %1745 = vrot.lane.b32.xlu0 %v1744_v32, %s2054_s18  ;;  %v1707_v36 = vrot.slane %v2587_v6, 2  ;;  %v1678_v23 = vrot.slane %v2498_v13, 3  ;;  %v1706_v28 = vsel %vm1403_vm6, %v1705_v56, %v1704_v27  ;;  %v3455_v32 = vld [vmem:[#allocation10_spill] sm:$0xff] }
 0x50d   :  { %v3095_v50 = vsel %vm1406_vm7, %v3448_v3, %v1870_v59  ;;  %v1776_v0 = vsel %vm1403_vm6, %v1775_v16, %v1774_v63  ;;  %v3450_v30 = vrot.slane %v2488_v46, 5  ;;  %v1813_v59 = vrot.slane %v3045_v26, 7 }
 0x50e   :  { %v1795_v33 = vrot.slane %v3045_v26, 6  ;;  %v3451_v29 = vrot.slane %v2480_v42, 7  ;;  %v3452_v61 = vrot.slane %v2500_v14, 6  ;;  %v1822_v7 = vrot.slane %v2576_v37, 5 }
 0x50f   :  { %v1850_v5 = vsel %vm1397_vm4, %v3450_v30, %v3449_v21  ;;  %v3116_v56 = vpop.f32.mrf.mxu3  ;;  %v3453_v27 = vrot.slane %v2486_v45, 5  ;;  %v3454_v51 = vrot.slane %v2504_v15, 4  ;;  %v1709_v16 = vrot.slane %v3045_v26, 1  ;;  %v3458_v30 = vld [vmem:[#allocation8_spill] sm:$0xff] }
 0x510   :  { %v1821_v17 = vsel %vm1391_vm2, %v3452_v61, %v3451_v29  ;;  %v1779_v60 = vrot.slane %v3045_v26, 5  ;;  %v3456_v42 = vrot.slane %v2488_v46, 1  ;;  %v1961_v24 = vrot.slane %v3116_v56, 7 }
 0x511   :  { %v1933_v44 = vsel %vm1391_vm2, %v3454_v51, %v3453_v27  ;;  %v1708_v37 = vsel %vm1406_vm7, %v1707_v36, %v1706_v28  ;;  %v1778_v63 = vsel %vm1406_vm7, %v1777_v9, %v1776_v0  ;;  %v3457_v57 = vrot.slane %v2506_v53, 4 }
 0x512   :  { %v1921_v14 = vsel %vm1397_vm4, %v3456_v42, %v3455_v32  ;;  %v1891_v21 = vrot.slane %v3116_v56, 3  ;;  %v3139_v29 = vsel %vm1409_vm8, %v3116_v56, %v3458_v30  ;;  %v1710_v61 = vsel %vm1409_vm8, %v1709_v16, %v1708_v37 }
 0x513   :  { %v1852_v3 = vsel %vm1400_vm5, %v3457_v57, %v1850_v5  ;;  %v1780_v27 = vsel %vm1409_vm8, %v1779_v60, %v1778_v63  ;;  %v1814_v36 = vsel %vm1409_vm8, %v1813_v59, %v2876_v52  ;;  %v1796_v9 = vsel %vm1409_vm8, %v1795_v33, %v2879_v18  ;;  %1712 = vst.msk [vmem:[%s3395_s3 + $0x20] sm:$0xff] %vm1412_vm9, %v1710_v61 }
 0x514   :  { %v1962_v28 = vsel %vm1409_vm8, %v1961_v24, %v1960_v62  ;;  %v1922_v0 = vsel %vm1400_vm5, %v2506_v53, %v1921_v14  ;;  %v1900_v5 = vrot.slane %v2628_v11, 1  ;;  %1815 = vrot.lane.b32.xlu2 %v1814_v36, %s2054_s18  ;;  %1797 = vrot.lane.b32.xlu1 %v1796_v9, %s2056_s20  ;;  %v1677_v52 = vsel %vm1397_vm4, %v1676_v35, %v1675_v41  ;;  %v3459_v62 = vld [vmem:[#allocation7_spill] sm:$0xff] }
 0x515   :  { %v1680_v18 = vrot.slane %v2538_v20, 2  ;;  %v3163_v59 = vsel %vm1409_vm8, %v1891_v21, %v3459_v62  ;;  %1782 = vst.msk [vmem:[%s3395_s3 + $0x28] sm:$0xff] %vm1412_vm9, %v1780_v27  ;;  %1963 = vrot.lane.b32.xlu0 %v1962_v28, %s2054_s18  ;;  %v1824_v33 = vrot.slane %v2483_v43, 4  ;;  %v1936_v51 = vrot.slane %v2488_v46, 2 }
 0x516   :  { %v1855_v16 = vrot.slane %v2644_v1, 2  ;;  %v1925_v35 = vrot.slane %v2644_v1, 6  ;;  %v1823_v41 = vsel %vm1394_vm3, %v1822_v7, %v1821_v17  ;;  %v3460_v60 = vrot.slane %v2628_v11, 3 }
 0x517   :  { %v1854_v42 = vsel %vm1403_vm6, %v1853_v55, %v1852_v3  ;;  %v1924_v43 = vsel %vm1403_vm6, %v1923_v19, %v1922_v0  ;;  %v1464_v14 = vrot.slane %v2910_v34, 4  ;;  %v1873_v24 = vrot.slane %v3116_v56, 2 }
 0x518   :  { %v1935_v32 = vsel %vm1394_vm3, %v3460_v60, %v1933_v44  ;;  %v1679_v37 = vsel %vm1400_vm5, %v1678_v23, %v1677_v52  ;;  %v1826_v17 = vrot.slane %v3445_v22, 3  ;;  %v1613_v11 = vrot.slane %v2977_v58, 4 }
 0x519   :  { %v1938_v7 = vrot.slane %v2506_v53, 1  ;;  %v1857_v44 = vrot.slane %v3116_v56, 1  ;;  %v1927_v55 = vrot.slane %v3116_v56, 5  ;;  %v1825_v63 = vsel %vm1397_vm4, %v1824_v33, %v1823_v41 }
 0x51a   :  { %v1937_v19 = vsel %vm1397_vm4, %v1936_v51, %v1935_v32  ;;  %v1856_v57 = vsel %vm1406_vm7, %v1855_v16, %v1854_v42  ;;  %v1926_v3 = vsel %vm1406_vm7, %v1925_v35, %v1924_v43  ;;  %v1828_v23 = vrot.slane %v2581_v2, 2 }
 0x51b   :  { %v1508_v22 = vrot.slane %v2508_v54, 4  ;;  %v1858_v21 = vsel %vm1409_vm8, %v1857_v44, %v1856_v57  ;;  %v1928_v30 = vsel %vm1409_vm8, %v1927_v55, %v1926_v3  ;;  %v1465_v61 = vsel %vm1409_vm8, %v1464_v14, %v2885_v8 }
 0x51c   :  { %v1874_v27 = vsel %vm1409_vm8, %v1873_v24, %v3095_v50  ;;  %v3461_v36 = vrot.slane %v2486_v45, 3  ;;  %v3462_v9 = vrot.slane %v2504_v15, 2  ;;  %v3463_v2 = vrot.slane %v2472_v38, 6  ;;  %1860 = vst.msk [vmem:[%s3395_s3 + $0x30] sm:$0xff] %vm1412_vm9, %v1858_v21  ;;  %1466 = vrot.lane.b32.xlu2 %v1465_v61, %s2052_s15  ;;  %v3467_v21 = vld [vmem:[#allocation6_spill] sm:$0xff] }
 0x51d   :  { %v3464_v54 = vrot.slane %v2491_v48, 5  ;;  %v1614_v45 = vsel %vm1409_vm8, %v1613_v11, %v3082_v47  ;;  %1875 = vrot.lane.b32.xlu1 %v1874_v27, %s2056_s20  ;;  %v1827_v15 = vsel %vm1400_vm5, %v1826_v17, %v1825_v63  ;;  %v1939_v38 = vsel %vm1400_vm5, %v1938_v7, %v1937_v19  ;;  %1930 = vst.msk [vmem:[%s3395_s3 + $0x38] sm:$0xff] %vm1412_vm9, %v1928_v30 }
 0x51e   :  { %v1899_v28 = vsel %vm1391_vm2, %v3462_v9, %v3461_v36  ;;  %v1653_v48 = vrot.slane %v2476_v40, 6  ;;  %1615 = vrot.lane.b32.xlu0 %v1614_v45, %s2052_s15  ;;  %v1682_v8 = vrot.slane %v2544_v25, 1  ;;  %v1830_v50 = vrot.slane %v2587_v6, 1 }
 0x51f   :  { %v1507_v0 = vsel %vm1391_vm2, %v3464_v54, %v3463_v2  ;;  %v1510_v47 = vrot.slane %v2474_v39, 3  ;;  %v1681_v52 = vsel %vm1403_vm6, %v1680_v18, %v1679_v37  ;;  %v1941_v62 = vrot.slane %v2644_v1, 7  ;;  %v3465_v39 = vld [vmem:[#allocation3_spill] sm:$0xff]  ;;  %v3466_v37 = vld [vmem:[#allocation5_spill] sm:$0xff] }
 0x520   :  { %v1901_v33 = vsel %vm1394_vm3, %v1900_v5, %v1899_v28  ;;  %v1509_v51 = vsel %vm1394_vm3, %v1508_v22, %v1507_v0  ;;  %v1654_v16 = vrot.slane %v2496_v49, 5  ;;  %v1829_v40 = vsel %vm1403_vm6, %v1828_v23, %v1827_v15 }
 0x521   :  { %v1940_v35 = vsel %vm1403_vm6, %v2637_v31, %v1939_v38  ;;  %v1943_v41 = vrot.slane %v3116_v56, 6  ;;  %v1903_v6 = vrot.slane %v2506_v53, 7  ;;  %v1512_v60 = vrot.slane %v3465_v39, 2 }
 0x522   :  { %v1683_v18 = vsel %vm1406_vm7, %v1682_v8, %v1681_v52  ;;  %v1902_v5 = vsel %vm1397_vm4, %v2488_v46, %v1901_v33  ;;  %v1511_v32 = vsel %vm1397_vm4, %v1510_v47, %v1509_v51  ;;  %v1831_v49 = vsel %vm1406_vm7, %v1830_v50, %v1829_v40 }
 0x523   :  { %v1942_v42 = vsel %vm1406_vm7, %v1941_v62, %v1940_v35  ;;  %v1905_v43 = vrot.slane %v2637_v31, 6  ;;  %v1656_v14 = vrot.slane %v2532_v10, 4  ;;  %v1684_v53 = vsel %vm1409_vm8, %v2977_v58, %v1683_v18 }
 0x524   :  { %v1944_v24 = vsel %vm1409_vm8, %v1943_v41, %v1942_v42  ;;  %v1514_v17 = vrot.slane %v3466_v37, 1  ;;  %v1655_v11 = vsel %vm1391_vm2, %v1654_v16, %v1653_v48  ;;  %1685 = vrot.lane.b32.xlu2 %v1684_v53, %s2052_s15  ;;  %v1832_v46 = vsel %vm1409_vm8, %v3045_v26, %v1831_v49 }
 0x525   :  { %1945 = vrot.lane.b32.xlu1 %v1944_v24, %s2056_s20  ;;  %v1904_v31 = vsel %vm1400_vm5, %v1903_v6, %v1902_v5  ;;  %v1513_v10 = vsel %vm1400_vm5, %v1512_v60, %v1511_v32  ;;  %v1658_v7 = vrot.slane %v2478_v4, 3  ;;  %v1907_v44 = vrot.slane %v2644_v1, 5 }
 0x526   :  { %1833 = vrot.lane.b32.xlu0 %v1832_v46, %s2052_s15  ;;  %v1657_v55 = vsel %vm1394_vm3, %v1656_v14, %v1655_v11  ;;  %v1906_v63 = vsel %vm1403_vm6, %v1905_v43, %v1904_v31  ;;  %v1909_v19 = vrot.slane %v3116_v56, 4  ;;  %v1515_v26 = vsel %vm1403_vm6, %v1514_v17, %v1513_v10 }
 0x527   :  { %v1517_v57 = vrot.slane %v2910_v34, 7  ;;  %v1660_v3 = vrot.slane %v2498_v13, 2  ;;  %v1659_v23 = vsel %vm1397_vm4, %v1658_v7, %v1657_v55  ;;  %v1908_v22 = vsel %vm1406_vm7, %v1907_v44, %v1906_v63 }
 0x528   :  { %v1516_v4 = vsel %vm1406_vm7, %v3467_v21, %v1515_v26  ;;  %v1910_v1 = vsel %vm1409_vm8, %v1909_v19, %v1908_v22  ;;  %v1662_v61 = vrot.slane %v2538_v20, 1  ;;  %v1665_v56 = vrot.slane %v2977_v58, 7  ;;  %v3468_v20 = vld [vmem:[#allocation11_spill] sm:$0xff] }
 0x529   :  { %v1518_v30 = vsel %vm1409_vm8, %v1517_v57, %v1516_v4  ;;  %v1661_v34 = vsel %vm1400_vm5, %v1660_v3, %v1659_v23 }
 0x52a   :  { %v1663_v13 = vsel %vm1403_vm6, %v1662_v61, %v1661_v34 }
 0x52b   :  { %v1664_v27 = vsel %vm1406_vm7, %v2544_v25, %v1663_v13 }
 0x52c   :  { %1911 = vrot.lane.b32.xlu2 %v1910_v1, %s2052_s15  ;;  %v1666_v36 = vsel %vm1409_vm8, %v1665_v56, %v1664_v27 }
 0x52d   :  { %1519 = vrot.lane.b32.xlu1 %v1518_v30, %s2054_s18 }
 0x535   :  { %1667 = vrot.lane.b32.xlu1 %v1666_v36, %s2054_s18 }
 0x53d   :  { %1893 = vrot.lane.b32.xlu1 %v3163_v59, %s2054_s18 }
 0x545   :  { %1537 = vrot.lane.b32.xlu1 %v3468_v20, %s2052_s15 }
 0x54d   :  { %1763 = vrot.lane.b32.xlu1 %v3085_v12, %s2052_s15 }
 0x555   :  { %1981 = vrot.lane.b32.xlu1 %v3139_v29, %s2052_s15  ;;  %v1502_v58 = vpop.permute.xlu2 %1501 }
 0x556   :  { %1504 = vst.msk [vmem:[%s3395_s3 + $0x8] sm:$0xff] %vm1431_vm10, %v1502_v58 }
 0x55d   :  { %v1448_v25 = vpop.permute.xlu2 %1447 }
 0x565   :  { %v1598_v9 = vpop.permute.xlu2 %1597 }
 0x56d   :  { %v1429_v28 = vpop.permute.xlu1 %1428 }
 0x56e   :  { %v1816_v59 = vpop.permute.xlu2 %1815  ;;  %1432 = vst.msk [vmem:[%s3395_s3] sm:$0xff] %vm1431_vm10, %v1429_v28 }
 0x56f   :  { %1451 = vst.msk [vmem:[%s3395_s3] sm:$0xff] %vm1450_vm11, %v1448_v25 }
 0x575   :  { %v1650_v29 = vpop.permute.xlu1 %1649 }
 0x576   :  { %v1467_v12 = vpop.permute.xlu2 %1466  ;;  %v1580_v2 = vpop.permute.xlu0 %1579  ;;  %1652 = vst.msk [vmem:[%s3395_s3 + $0x18] sm:$0xff] %vm1431_vm10, %v1650_v29 }
 0x577   :  { %1470 = vst.msk [vmem:[%s3395_s3] sm:$0xff] %vm1469_vm12, %v1467_v12 }
 0x578   :  { %1582 = vst.msk [vmem:[%s3395_s3 + $0x10] sm:$0xff] %vm1431_vm10, %v1580_v2 }
 0x579   :  { %1600 = vst.msk [vmem:[%s3395_s3 + $0x10] sm:$0xff] %vm1450_vm11, %v1598_v9 }
 0x57d   :  { %v1728_v54 = vpop.permute.xlu1 %1727 }
 0x57e   :  { %v1746_v0 = vpop.permute.xlu0 %1745  ;;  %1730 = vst.msk [vmem:[%s3395_s3 + $0x20] sm:$0xff] %vm1431_vm10, %v1728_v54  ;;  %v1686_v52 = vpop.permute.xlu2 %1685 }
 0x57f   :  { %1748 = vst.msk [vmem:[%s3395_s3 + $0x20] sm:$0xff] %vm1450_vm11, %v1746_v0 }
 0x586   :  { %v1798_v45 = vpop.permute.xlu1 %1797  ;;  %v1912_v51 = vpop.permute.xlu2 %1911 }
 0x587   :  { %v1964_v15 = vpop.permute.xlu0 %1963  ;;  %1800 = vst.msk [vmem:[%s3395_s3 + $0x28] sm:$0xff] %vm1431_vm10, %v1798_v45 }
 0x588   :  { %1818 = vst.msk [vmem:[%s3395_s3 + $0x28] sm:$0xff] %vm1450_vm11, %v1816_v59 }
 0x58f   :  { %v1876_v38 = vpop.permute.xlu1 %1875 }
 0x590   :  { %v1616_v48 = vpop.permute.xlu0 %1615  ;;  %1878 = vst.msk [vmem:[%s3395_s3 + $0x30] sm:$0xff] %vm1431_vm10, %v1876_v38 }
 0x591   :  { %1618 = vst.msk [vmem:[%s3395_s3 + $0x10] sm:$0xff] %vm1469_vm12, %v1616_v48 }
 0x597   :  { %v1946_v8 = vpop.permute.xlu1 %1945 }
 0x598   :  { %v1834_v50 = vpop.permute.xlu0 %1833  ;;  %1948 = vst.msk [vmem:[%s3395_s3 + $0x38] sm:$0xff] %vm1431_vm10, %v1946_v8 }
 0x599   :  { %1836 = vst.msk [vmem:[%s3395_s3 + $0x28] sm:$0xff] %vm1469_vm12, %v1834_v50 }
 0x59a   :  { %1966 = vst.msk [vmem:[%s3395_s3 + $0x38] sm:$0xff] %vm1450_vm11, %v1964_v15 }
 0x59f   :  { %v1520_v47 = vpop.permute.xlu1 %1519 }
 0x5a0   :  { %1522 = vst.msk [vmem:[%s3395_s3 + $0x8] sm:$0xff] %vm1450_vm11, %v1520_v47 }
 0x5a7   :  { %v1668_v62 = vpop.permute.xlu1 %1667 }
 0x5a8   :  { %1670 = vst.msk [vmem:[%s3395_s3 + $0x18] sm:$0xff] %vm1450_vm11, %v1668_v62 }
 0x5a9   :  { %1688 = vst.msk [vmem:[%s3395_s3 + $0x18] sm:$0xff] %vm1469_vm12, %v1686_v52 }
 0x5af   :  { %v1894_v33 = vpop.permute.xlu1 %1893 }
 0x5b0   :  { %1896 = vst.msk [vmem:[%s3395_s3 + $0x30] sm:$0xff] %vm1450_vm11, %v1894_v33 }
 0x5b1   :  { %1914 = vst.msk [vmem:[%s3395_s3 + $0x30] sm:$0xff] %vm1469_vm12, %v1912_v51 }
 0x5b7   :  { %v1538_v16 = vpop.permute.xlu1 %1537 }
 0x5b8   :  { %1540 = vst.msk [vmem:[%s3395_s3 + $0x8] sm:$0xff] %vm1469_vm12, %v1538_v16 }
 0x5bf   :  { %v1764_v40 = vpop.permute.xlu1 %1763 }
 0x5c0   :  { %1766 = vst.msk [vmem:[%s3395_s3 + $0x20] sm:$0xff] %vm1469_vm12, %v1764_v40 }
 0x5c7   :  { %v1982_v35 = vpop.permute.xlu1 %1981 }
 0x5c8   :  { %1984 = vst.msk [vmem:[%s3395_s3 + $0x38] sm:$0xff] %vm1469_vm12, %v1982_v35 }

</bundles_post_ra>
